<compile_context>
chip_gen: v7x
topology: tpu7x:2x2x1
jax: 0.10.0
libtpu: 0.0.40
codegen_flags: <defaults>
</compile_context>

<pallas_src>
import functools

import jax
import jax.numpy as jnp
import numpy as np
from jax import lax
from jax.experimental import pallas as pl
from jax.experimental.pallas import tpu as pltpu


def _pide_kernel(seq_len_ref,        # SMEM (B_pad,) int32   (scalar prefetch)
                 feat_ref,           # VMEM (BB, T, D) input dtype
                 scores_ref,         # VMEM (BB, 1, T) f32   (lane-major scores)
                 out_ref,            # VMEM (1, 8, 128) f32  (sublane 0 = num, 1 = den)
                 *, temperature, block_batch, unroll):
    g = pl.program_id(0)
    T = feat_ref.shape[1]
    inv_temp = jnp.float32(1.0 / temperature)
    big = jnp.float32(1e30)

    t_lane = lax.broadcasted_iota(jnp.int32, (1, T), 1)     # lane index (1, T)
    t_row2 = lax.broadcasted_iota(jnp.int32, (2, T), 1)     # lane index (2, T)
    row_sel = lax.broadcasted_iota(jnp.int32, (2, 1), 0)    # row 0 = max, row 1 = min
    t_sub = lax.broadcasted_iota(jnp.int32, (T, 1), 0)      # sublane index (T, 1)
    col2 = lax.broadcasted_iota(jnp.int32, (1, 2), 1)       # column 0 = max, 1 = min

    def body(i, carry):
        num_sum, den_sum = carry

        ff = feat_ref[i]                           # (T, D) in the INPUT dtype
        scores = scores_ref[i]                     # (1, T) f32
        valid_len = seq_len_ref[g * block_batch + i]
        has_valid = valid_len > 0
        valid = t_lane < valid_len                 # (1, T)

        # --- first-occurrence argmax / argmin over the valid prefix (lane-major) ---
        m_max = jnp.where(valid, scores, -big)
        m_min = jnp.where(valid, scores, big)
        max_val = jnp.max(m_max, axis=1, keepdims=True)                       # (1, 1)
        min_val = jnp.min(m_min, axis=1, keepdims=True)                       # (1, 1)
        max_idx = jnp.min(jnp.where((m_max == max_val) & valid, t_lane, T),
                          axis=1, keepdims=True)                              # (1, 1)
        min_idx = jnp.min(jnp.where((m_min == min_val) & valid, t_lane, T),
                          axis=1, keepdims=True)                              # (1, 1)
        same = max_idx == min_idx                                             # (1, 1)

        # --- row norms (normalization deferred: no (T, D) feature scaling) ---
        sumsq = jnp.sum((ff * ff).astype(jnp.float32), axis=-1, keepdims=True)  # (T, 1)
        inv_norm = lax.rsqrt(jnp.maximum(sumsq, 1e-24))                         # (T, 1)
        # (== 1 / max(sqrt(sumsq), 1e-12), matching F.normalize eps=1e-12)

        # --- select the two raw positive rows (one-hot matmul, native orientation) ---
        target2 = jnp.where(row_sel == 0, max_idx, min_idx)                   # (2, 1)
        onehot = (t_row2 == target2).astype(ff.dtype)                         # (2, T)
        sel = lax.dot_general(onehot, ff, (((1,), (0,)), ((), ())),
                              preferred_element_type=jnp.float32)             # (2, D)
        sel = sel.astype(ff.dtype)                 # exact row copies (bf16-safe)

        # --- raw similarity of every row against the 2 selected rows (native lhs) ---
        sim = lax.dot_general(ff, sel, (((1,), (1,)), ((), ())),
                              preferred_element_type=jnp.float32)             # (T, 2)

        # --- rescale: row t gets inv_norm[t], column j gets inv_norm[target_j] ---
        target12 = jnp.where(col2 == 0, max_idx, min_idx)                     # (1, 2)
        mask_sel = t_sub == target12                                          # (T, 2)
        sel_inv = jnp.sum(jnp.where(mask_sel, inv_norm, 0.0),
                          axis=0, keepdims=True)                              # (1, 2)
        sim = sim * (inv_norm * inv_temp) * sel_inv                           # (T, 2)

        # --- contrastive log-prob on the two diagonal entries ---
        diag = jnp.sum(jnp.where(mask_sel, sim, 0.0), axis=0, keepdims=True)  # (1, 2)
        denom = jnp.sum(jnp.exp(sim), axis=0, keepdims=True)                  # (1, 2)
        log_prob = diag - jnp.log(denom + 1e-8)                               # (1, 2)

        # When argmax == argmin the min label overwrites the max -> only ONE positive
        # pair ((idx, idx)); otherwise two positive pairs ((max,max), (min,min)).
        keep = jnp.where(col2 == 0, 1.0, jnp.where(same, 0.0, 1.0))           # (1, 2)
        num_b = jnp.where(has_valid,
                          jnp.sum(log_prob * keep, axis=1, keepdims=True), 0.0)
        den_b = jnp.where(has_valid,
                          jnp.sum(keep, axis=1, keepdims=True), 0.0)
        return num_sum + num_b, den_sum + den_b

    zero = jnp.zeros((1, 1), jnp.float32)
    num_sum, den_sum = lax.fori_loop(0, block_batch, body, (zero, zero),
                                     unroll=unroll)

    # Pack both partials into a single lane-dense (1, 8, 128) output tile:
    # sublane 0 broadcasts the numerator, sublane 1 the denominator.
    ones_t = jnp.ones((1, 8, 128), jnp.float32)
    sub = lax.broadcasted_iota(jnp.int32, (1, 8, 128), 1)
    out_ref[...] = jnp.where(sub == 0, num_sum * ones_t,
                             jnp.where(sub == 1, den_sum * ones_t, 0.0))


def pide_loss(features, element_scores, seq_len, temperature=0.1, block_batch=None):
    """Pallas implementation of PseudoInstanceDiscriminativeEnhancement.forward."""
    B, T, D = features.shape
    # Lane-major scores (B, 1, T); features keep their input dtype (pass bf16 to
    # halve HBM traffic on v6e/v7x; v5e still gets the DMA win).
    scores = element_scores.reshape(B, 1, T).astype(jnp.float32)
    seq_len = seq_len.astype(jnp.int32)

    itemsize = jnp.dtype(features.dtype).itemsize
    per_item_bytes = max(T * D * itemsize, 1)

    if block_batch is None:
        # Amortize the ~0.35us per-grid-step overhead: target ~4 MiB of feature
        # bytes per step (double-buffered -> ~8 MiB, within the scoped-VMEM limit
        # set below on all of v5e/v6e/v7x), but keep grid >= 2 so the "parallel"
        # batch axis can be sharded across both v7x TensorCores.
        target_bytes = 4 << 20
        bb = max(1, target_bytes // per_item_bytes)
        if B >= 2:
            bb = min(bb, -(-B // 2))
    else:
        bb = int(block_batch)
    bb = int(max(1, min(bb, B)))

    grid = -(-B // bb)
    b_pad = grid * bb
    if b_pad != B:
        pad = b_pad - B
        features = jnp.pad(features, ((0, pad), (0, 0), (0, 0)))
        scores = jnp.pad(scores, ((0, pad), (0, 0), (0, 0)))
        seq_len = jnp.pad(seq_len, (0, pad))      # padded batches: seq_len=0 -> contribute 0

    # Unroll the per-item loop only while the live (T, D) tiles stay vreg-friendly.
    per_item_elems = T * D
    if per_item_elems <= 4096:
        unroll = int(min(bb, 8))
    elif per_item_elems <= 65536:
        unroll = 2
    else:
        unroll = 1

    # VMEM budget: double-buffered feature + score input tiles + packed output tile.
    need = 2 * (bb * T * D * itemsize + bb * T * 4 + 8 * 128 * 4)
    vmem_limit = int(min(max(need + (4 << 20), 32 << 20), 96 << 20))

    kernel = functools.partial(_pide_kernel,
                               temperature=float(temperature),
                               block_batch=bb,
                               unroll=unroll)

    grid_spec = pltpu.PrefetchScalarGridSpec(
        num_scalar_prefetch=1,
        grid=(grid,),
        in_specs=[
            pl.BlockSpec((bb, T, D), lambda g, sl: (g, 0, 0)),
            pl.BlockSpec((bb, 1, T), lambda g, sl: (g, 0, 0)),
        ],
        out_specs=pl.BlockSpec((1, 8, 128), lambda g, sl: (g, 0, 0)),
    )

    out = pl.pallas_call(
        kernel,
        out_shape=jax.ShapeDtypeStruct((grid, 8, 128), jnp.float32),
        grid_spec=grid_spec,
        compiler_params=pltpu.CompilerParams(
            dimension_semantics=("parallel",),
            vmem_limit_bytes=vmem_limit),
    )(seq_len, features, scores)

    num_total = jnp.sum(out[:, 0, 0])
    den_total = jnp.sum(out[:, 1, 0])
    return -num_total / (den_total + 1e-8)


def _reference_loss(features, element_scores, seq_len, temperature=0.1):
    """NumPy transcription of the PyTorch forward, for verification."""
    features = np.asarray(features, np.float32)
    scores = np.asarray(element_scores, np.float32)
    seq_len = np.asarray(seq_len)
    B, T, D = features.shape
    labels = np.zeros((B, T), np.float32)
    for i in range(B):
        L = int(seq_len[i])
        if L > 0:
            vs = scores[i, :L, 0]
            labels[i, int(np.argmax(vs))] = 1.0
            labels[i, int(np.argmin(vs))] = -1.0
    norm = np.linalg.norm(features, axis=-1, keepdims=True)
    nf = features / np.maximum(norm, 1e-12)
    sim = np.einsum('btd,bsd->bts', nf, nf) / temperature
    mask = labels[:, None, :] * labels[:, :, None]
    log_prob = sim - np.log(np.exp(sim).sum(-1, keepdims=True) + 1e-8)
    mp = (mask > 0).astype(np.float32)
    return float(-(mp * log_prob).sum() / (mp.sum() + 1e-8))


if __name__ == "__main__":
    B, T, D = 10, 16, 32
    key = jax.random.PRNGKey(0)
    k1, k2 = jax.random.split(key)

    features = jax.random.normal(k1, (B, T, D), dtype=jnp.float32)
    element_scores = jax.nn.sigmoid(
        jax.random.normal(k2, (B, T, 1), dtype=jnp.float32))
    # Mix of full, partial, length-1 (argmax==argmin) and empty (ignored) sequences.
    seq_len = jnp.array([16, 12, 7, 1, 0, 16, 3, 9, 16, 5], dtype=jnp.int32)

    loss = pide_loss(features, element_scores, seq_len, temperature=0.1)
    loss = jax.block_until_ready(loss)

    ref = _reference_loss(features, element_scores, seq_len, temperature=0.1)
    assert np.allclose(float(loss), ref, rtol=2e-4, atol=5e-5), (float(loss), ref)

    # bf16 feature path (half the HBM traffic): smoke-test that it compiles and runs.
    loss_bf16 = jax.block_until_ready(
        pide_loss(features.astype(jnp.bfloat16), element_scores, seq_len,
                  temperature=0.1))
    assert np.isfinite(float(loss_bf16))

    print("KERNEL_OK")
</pallas_src>

<mosaic_0001>
module attributes {stable_mosaic.version = 11 : i64} {
  func.func @_pide_kernel(%arg0: i32, %arg1: memref<10xi32, #tpu.memory_space<smem>>, %arg2: memref<5x16x32xf32, #tpu.memory_space<vmem>>, %arg3: memref<5x1x16xf32, #tpu.memory_space<vmem>>, %arg4: memref<1x8x128xf32, #tpu.memory_space<vmem>>) attributes {dimension_semantics = [#tpu.dimension_semantics<parallel>], iteration_bounds = array<i64: 2>, scalar_prefetch = 1 : i64, scratch_operands = 0 : i64, tpu.core_type = #tpu.core_type<tc>, window_params = [{transform_indices = @transform_0, window_bounds = array<i64: 5, 16, 32>}, {transform_indices = @transform_1, window_bounds = array<i64: 5, 1, 16>}, {transform_indices = @transform_2, window_bounds = array<i64: 1, 8, 128>}]} {
    %0 = tpu.iota {dimensions = array<i32: 1>} : vector<1x16xi32>
    %1 = tpu.iota {dimensions = array<i32: 1>} : vector<2x16xi32>
    %2 = tpu.iota {dimensions = array<i32: 0>} : vector<2x1xi32>
    %3 = tpu.iota {dimensions = array<i32: 0>} : vector<16x1xi32>
    %4 = tpu.iota {dimensions = array<i32: 1>} : vector<1x2xi32>
    %cst = arith.constant 0.000000e+00 : f32
    %5 = vector.broadcast %cst : f32 to vector<1x1xf32>
    %cst_0 = arith.constant 1.000000e+30 : f32
    %cst_1 = arith.constant 1.000000e+01 : f32
    %c0_i32 = arith.constant 0 : i32
    %6 = arith.index_cast %c0_i32 : i32 to index
    %c0 = arith.constant 0 : index
    %c0_2 = arith.constant 0 : index
    %7 = vector.load %arg2[%6, %c0, %c0_2] : memref<5x16x32xf32, #tpu.memory_space<vmem>>, vector<1x16x32xf32>
    %8 = vector.shape_cast %7 : vector<1x16x32xf32> to vector<16x32xf32>
    %9 = arith.index_cast %c0_i32 : i32 to index
    %c0_3 = arith.constant 0 : index
    %c0_4 = arith.constant 0 : index
    %10 = vector.load %arg3[%9, %c0_3, %c0_4] : memref<5x1x16xf32, #tpu.memory_space<vmem>>, vector<1x1x16xf32>
    %11 = vector.shape_cast %10 : vector<1x1x16xf32> to vector<1x16xf32>
    %c5_i32 = arith.constant 5 : i32
    %12 = arith.muli %arg0, %c5_i32 : i32
    %13 = arith.addi %12, %c0_i32 : i32
    %14 = arith.index_cast %13 : i32 to index
    %15 = memref.load %arg1[%14] : memref<10xi32, #tpu.memory_space<smem>>
    %c0_i32_5 = arith.constant 0 : i32
    %16 = arith.cmpi sgt, %15, %c0_i32_5 : i32
    %17 = vector.broadcast %15 : i32 to vector<1x16xi32>
    %18 = arith.cmpi slt, %0, %17 : vector<1x16xi32>
    %cst_6 = arith.constant 0.000000e+00 : f32
    %19 = arith.subf %cst_6, %cst_0 : f32
    %20 = vector.broadcast %19 : f32 to vector<1x16xf32>
    %21 = arith.select %18, %11, %20 : vector<1x16xi1>, vector<1x16xf32>
    %22 = vector.broadcast %cst_0 : f32 to vector<1x16xf32>
    %23 = arith.select %18, %11, %22 : vector<1x16xi1>, vector<1x16xf32>
    %cst_7 = arith.constant dense<0xFF800000> : vector<1xf32>
    %24 = vector.multi_reduction <maximumf>, %21, %cst_7 [1] : vector<1x16xf32> to vector<1xf32>
    %25 = vector.shape_cast %24 : vector<1xf32> to vector<1x1xf32>
    %cst_8 = arith.constant dense<0x7F800000> : vector<1xf32>
    %26 = vector.multi_reduction <minimumf>, %23, %cst_8 [1] : vector<1x16xf32> to vector<1xf32>
    %27 = vector.shape_cast %26 : vector<1xf32> to vector<1x1xf32>
    %28 = vector.broadcast %25 : vector<1x1xf32> to vector<1x16xf32>
    %29 = arith.cmpf oeq, %21, %28 : vector<1x16xf32>
    %30 = arith.andi %29, %18 : vector<1x16xi1>
    %c16_i32 = arith.constant 16 : i32
    %31 = vector.broadcast %c16_i32 : i32 to vector<1x16xi32>
    %32 = arith.select %30, %0, %31 : vector<1x16xi1>, vector<1x16xi32>
    %cst_9 = arith.constant dense<2147483647> : vector<1xi32>
    %33 = vector.multi_reduction <minsi>, %32, %cst_9 [1] : vector<1x16xi32> to vector<1xi32>
    %34 = vector.shape_cast %33 : vector<1xi32> to vector<1x1xi32>
    %35 = vector.broadcast %27 : vector<1x1xf32> to vector<1x16xf32>
    %36 = arith.cmpf oeq, %23, %35 : vector<1x16xf32>
    %37 = arith.andi %36, %18 : vector<1x16xi1>
    %c16_i32_10 = arith.constant 16 : i32
    %38 = vector.broadcast %c16_i32_10 : i32 to vector<1x16xi32>
    %39 = arith.select %37, %0, %38 : vector<1x16xi1>, vector<1x16xi32>
    %cst_11 = arith.constant dense<2147483647> : vector<1xi32>
    %40 = vector.multi_reduction <minsi>, %39, %cst_11 [1] : vector<1x16xi32> to vector<1xi32>
    %41 = vector.shape_cast %40 : vector<1xi32> to vector<1x1xi32>
    %42 = arith.cmpi eq, %34, %41 : vector<1x1xi32>
    %43 = arith.mulf %8, %8 : vector<16x32xf32>
    %cst_12 = arith.constant dense<0.000000e+00> : vector<16xf32>
    %44 = vector.multi_reduction <add>, %43, %cst_12 [1] : vector<16x32xf32> to vector<16xf32>
    %45 = vector.shape_cast %44 : vector<16xf32> to vector<16x1xf32>
    %cst_13 = arith.constant 1.000000e-24 : f32
    %46 = vector.broadcast %cst_13 : f32 to vector<16x1xf32>
    %47 = arith.maximumf %45, %46 : vector<16x1xf32>
    %48 = math.rsqrt %47 : vector<16x1xf32>
    %c0_i32_14 = arith.constant 0 : i32
    %49 = vector.broadcast %c0_i32_14 : i32 to vector<2x1xi32>
    %50 = arith.cmpi eq, %2, %49 : vector<2x1xi32>
    %51 = vector.shape_cast %34 : vector<1x1xi32> to vector<1x1xi32>
    %52 = vector.broadcast %51 : vector<1x1xi32> to vector<2x1xi32>
    %53 = vector.shape_cast %41 : vector<1x1xi32> to vector<1x1xi32>
    %54 = vector.broadcast %53 : vector<1x1xi32> to vector<2x1xi32>
    %55 = arith.select %50, %52, %54 : vector<2x1xi1>, vector<2x1xi32>
    %56 = vector.broadcast %55 : vector<2x1xi32> to vector<2x16xi32>
    %57 = arith.cmpi eq, %1, %56 : vector<2x16xi32>
    %58 = arith.extui %57 : vector<2x16xi1> to vector<2x16xi32>
    %59 = arith.sitofp %58 : vector<2x16xi32> to vector<2x16xf32>
    %cst_15 = arith.constant dense<0.000000e+00> : vector<2x32xf32>
    %60 = tpu.matmul %59, %8, %cst_15 {dimension_numbers = #tpu.dot_dimension_numbers<[1], [0], [0], [1], [0, 0, 1, 1], [], []>} : vector<2x16xf32>, vector<16x32xf32>, vector<2x32xf32> -> vector<2x32xf32>
    %cst_16 = arith.constant dense<0.000000e+00> : vector<16x2xf32>
    %61 = tpu.matmul %8, %60, %cst_16 {dimension_numbers = #tpu.dot_dimension_numbers<[1], [1], [0], [0], [0, 0, 1, 0], [], []>} : vector<16x32xf32>, vector<2x32xf32>, vector<16x2xf32> -> vector<16x2xf32>
    %c0_i32_17 = arith.constant 0 : i32
    %62 = vector.broadcast %c0_i32_17 : i32 to vector<1x2xi32>
    %63 = arith.cmpi eq, %4, %62 : vector<1x2xi32>
    %64 = vector.shape_cast %34 : vector<1x1xi32> to vector<1x1xi32>
    %65 = vector.broadcast %64 : vector<1x1xi32> to vector<1x2xi32>
    %66 = vector.shape_cast %41 : vector<1x1xi32> to vector<1x1xi32>
    %67 = vector.broadcast %66 : vector<1x1xi32> to vector<1x2xi32>
    %68 = arith.select %63, %65, %67 : vector<1x2xi1>, vector<1x2xi32>
    %69 = vector.broadcast %3 : vector<16x1xi32> to vector<16x2xi32>
    %70 = vector.broadcast %68 : vector<1x2xi32> to vector<16x2xi32>
    %71 = arith.cmpi eq, %69, %70 : vector<16x2xi32>
    %cst_18 = arith.constant 0.000000e+00 : f32
    %72 = vector.shape_cast %48 : vector<16x1xf32> to vector<16x1xf32>
    %73 = vector.broadcast %72 : vector<16x1xf32> to vector<16x2xf32>
    %74 = vector.broadcast %cst_18 : f32 to vector<16x2xf32>
    %75 = arith.select %71, %73, %74 : vector<16x2xi1>, vector<16x2xf32>
    %cst_19 = arith.constant dense<0.000000e+00> : vector<2xf32>
    %76 = vector.multi_reduction <add>, %75, %cst_19 [0] : vector<16x2xf32> to vector<2xf32>
    %77 = vector.shape_cast %76 : vector<2xf32> to vector<1x2xf32>
    %78 = vector.broadcast %cst_1 : f32 to vector<16x1xf32>
    %79 = arith.mulf %48, %78 : vector<16x1xf32>
    %80 = vector.broadcast %79 : vector<16x1xf32> to vector<16x2xf32>
    %81 = arith.mulf %61, %80 : vector<16x2xf32>
    %82 = vector.broadcast %77 : vector<1x2xf32> to vector<16x2xf32>
    %83 = arith.mulf %81, %82 : vector<16x2xf32>
    %cst_20 = arith.constant 0.000000e+00 : f32
    %84 = vector.broadcast %cst_20 : f32 to vector<16x2xf32>
    %85 = arith.select %71, %83, %84 : vector<16x2xi1>, vector<16x2xf32>
    %cst_21 = arith.constant dense<0.000000e+00> : vector<2xf32>
    %86 = vector.multi_reduction <add>, %85, %cst_21 [0] : vector<16x2xf32> to vector<2xf32>
    %87 = vector.shape_cast %86 : vector<2xf32> to vector<1x2xf32>
    %88 = math.exp %83 : vector<16x2xf32>
    %cst_22 = arith.constant dense<0.000000e+00> : vector<2xf32>
    %89 = vector.multi_reduction <add>, %88, %cst_22 [0] : vector<16x2xf32> to vector<2xf32>
    %90 = vector.shape_cast %89 : vector<2xf32> to vector<1x2xf32>
    %cst_23 = arith.constant 9.99999993E-9 : f32
    %91 = vector.broadcast %cst_23 : f32 to vector<1x2xf32>
    %92 = arith.addf %90, %91 : vector<1x2xf32>
    %93 = math.log %92 : vector<1x2xf32>
    %94 = arith.subf %87, %93 : vector<1x2xf32>
    %c0_i32_24 = arith.constant 0 : i32
    %95 = vector.broadcast %c0_i32_24 : i32 to vector<1x2xi32>
    %96 = arith.cmpi eq, %4, %95 : vector<1x2xi32>
    %cst_25 = arith.constant 0.000000e+00 : f32
    %cst_26 = arith.constant 1.000000e+00 : f32
    %97 = vector.broadcast %cst_25 : f32 to vector<1x1xf32>
    %98 = vector.broadcast %cst_26 : f32 to vector<1x1xf32>
    %99 = arith.select %42, %97, %98 : vector<1x1xi1>, vector<1x1xf32>
    %cst_27 = arith.constant 1.000000e+00 : f32
    %100 = vector.broadcast %cst_27 : f32 to vector<1x2xf32>
    %101 = vector.shape_cast %99 : vector<1x1xf32> to vector<1x1xf32>
    %102 = vector.broadcast %101 : vector<1x1xf32> to vector<1x2xf32>
    %103 = arith.select %96, %100, %102 : vector<1x2xi1>, vector<1x2xf32>
    %104 = arith.mulf %94, %103 : vector<1x2xf32>
    %cst_28 = arith.constant dense<0.000000e+00> : vector<1xf32>
    %105 = vector.multi_reduction <add>, %104, %cst_28 [1] : vector<1x2xf32> to vector<1xf32>
    %106 = vector.shape_cast %105 : vector<1xf32> to vector<1x1xf32>
    %cst_29 = arith.constant 0.000000e+00 : f32
    %107 = vector.broadcast %cst_29 : f32 to vector<1x1xf32>
    %108 = arith.select %16, %106, %107 : vector<1x1xf32>
    %cst_30 = arith.constant dense<0.000000e+00> : vector<1xf32>
    %109 = vector.multi_reduction <add>, %103, %cst_30 [1] : vector<1x2xf32> to vector<1xf32>
    %110 = vector.shape_cast %109 : vector<1xf32> to vector<1x1xf32>
    %cst_31 = arith.constant 0.000000e+00 : f32
    %111 = vector.broadcast %cst_31 : f32 to vector<1x1xf32>
    %112 = arith.select %16, %110, %111 : vector<1x1xf32>
    %113 = arith.addf %5, %108 : vector<1x1xf32>
    %114 = arith.addf %5, %112 : vector<1x1xf32>
    %c1_i32 = arith.constant 1 : i32
    %115 = arith.index_cast %c1_i32 : i32 to index
    %c0_32 = arith.constant 0 : index
    %c0_33 = arith.constant 0 : index
    %116 = vector.load %arg2[%115, %c0_32, %c0_33] : memref<5x16x32xf32, #tpu.memory_space<vmem>>, vector<1x16x32xf32>
    %117 = vector.shape_cast %116 : vector<1x16x32xf32> to vector<16x32xf32>
    %118 = arith.index_cast %c1_i32 : i32 to index
    %c0_34 = arith.constant 0 : index
    %c0_35 = arith.constant 0 : index
    %119 = vector.load %arg3[%118, %c0_34, %c0_35] : memref<5x1x16xf32, #tpu.memory_space<vmem>>, vector<1x1x16xf32>
    %120 = vector.shape_cast %119 : vector<1x1x16xf32> to vector<1x16xf32>
    %c5_i32_36 = arith.constant 5 : i32
    %121 = arith.muli %arg0, %c5_i32_36 : i32
    %122 = arith.addi %121, %c1_i32 : i32
    %123 = arith.index_cast %122 : i32 to index
    %124 = memref.load %arg1[%123] : memref<10xi32, #tpu.memory_space<smem>>
    %c0_i32_37 = arith.constant 0 : i32
    %125 = arith.cmpi sgt, %124, %c0_i32_37 : i32
    %126 = vector.broadcast %124 : i32 to vector<1x16xi32>
    %127 = arith.cmpi slt, %0, %126 : vector<1x16xi32>
    %cst_38 = arith.constant 0.000000e+00 : f32
    %128 = arith.subf %cst_38, %cst_0 : f32
    %129 = vector.broadcast %128 : f32 to vector<1x16xf32>
    %130 = arith.select %127, %120, %129 : vector<1x16xi1>, vector<1x16xf32>
    %131 = vector.broadcast %cst_0 : f32 to vector<1x16xf32>
    %132 = arith.select %127, %120, %131 : vector<1x16xi1>, vector<1x16xf32>
    %cst_39 = arith.constant dense<0xFF800000> : vector<1xf32>
    %133 = vector.multi_reduction <maximumf>, %130, %cst_39 [1] : vector<1x16xf32> to vector<1xf32>
    %134 = vector.shape_cast %133 : vector<1xf32> to vector<1x1xf32>
    %cst_40 = arith.constant dense<0x7F800000> : vector<1xf32>
    %135 = vector.multi_reduction <minimumf>, %132, %cst_40 [1] : vector<1x16xf32> to vector<1xf32>
    %136 = vector.shape_cast %135 : vector<1xf32> to vector<1x1xf32>
    %137 = vector.broadcast %134 : vector<1x1xf32> to vector<1x16xf32>
    %138 = arith.cmpf oeq, %130, %137 : vector<1x16xf32>
    %139 = arith.andi %138, %127 : vector<1x16xi1>
    %c16_i32_41 = arith.constant 16 : i32
    %140 = vector.broadcast %c16_i32_41 : i32 to vector<1x16xi32>
    %141 = arith.select %139, %0, %140 : vector<1x16xi1>, vector<1x16xi32>
    %cst_42 = arith.constant dense<2147483647> : vector<1xi32>
    %142 = vector.multi_reduction <minsi>, %141, %cst_42 [1] : vector<1x16xi32> to vector<1xi32>
    %143 = vector.shape_cast %142 : vector<1xi32> to vector<1x1xi32>
    %144 = vector.broadcast %136 : vector<1x1xf32> to vector<1x16xf32>
    %145 = arith.cmpf oeq, %132, %144 : vector<1x16xf32>
    %146 = arith.andi %145, %127 : vector<1x16xi1>
    %c16_i32_43 = arith.constant 16 : i32
    %147 = vector.broadcast %c16_i32_43 : i32 to vector<1x16xi32>
    %148 = arith.select %146, %0, %147 : vector<1x16xi1>, vector<1x16xi32>
    %cst_44 = arith.constant dense<2147483647> : vector<1xi32>
    %149 = vector.multi_reduction <minsi>, %148, %cst_44 [1] : vector<1x16xi32> to vector<1xi32>
    %150 = vector.shape_cast %149 : vector<1xi32> to vector<1x1xi32>
    %151 = arith.cmpi eq, %143, %150 : vector<1x1xi32>
    %152 = arith.mulf %117, %117 : vector<16x32xf32>
    %cst_45 = arith.constant dense<0.000000e+00> : vector<16xf32>
    %153 = vector.multi_reduction <add>, %152, %cst_45 [1] : vector<16x32xf32> to vector<16xf32>
    %154 = vector.shape_cast %153 : vector<16xf32> to vector<16x1xf32>
    %cst_46 = arith.constant 1.000000e-24 : f32
    %155 = vector.broadcast %cst_46 : f32 to vector<16x1xf32>
    %156 = arith.maximumf %154, %155 : vector<16x1xf32>
    %157 = math.rsqrt %156 : vector<16x1xf32>
    %c0_i32_47 = arith.constant 0 : i32
    %158 = vector.broadcast %c0_i32_47 : i32 to vector<2x1xi32>
    %159 = arith.cmpi eq, %2, %158 : vector<2x1xi32>
    %160 = vector.shape_cast %143 : vector<1x1xi32> to vector<1x1xi32>
    %161 = vector.broadcast %160 : vector<1x1xi32> to vector<2x1xi32>
    %162 = vector.shape_cast %150 : vector<1x1xi32> to vector<1x1xi32>
    %163 = vector.broadcast %162 : vector<1x1xi32> to vector<2x1xi32>
    %164 = arith.select %159, %161, %163 : vector<2x1xi1>, vector<2x1xi32>
    %165 = vector.broadcast %164 : vector<2x1xi32> to vector<2x16xi32>
    %166 = arith.cmpi eq, %1, %165 : vector<2x16xi32>
    %167 = arith.extui %166 : vector<2x16xi1> to vector<2x16xi32>
    %168 = arith.sitofp %167 : vector<2x16xi32> to vector<2x16xf32>
    %cst_48 = arith.constant dense<0.000000e+00> : vector<2x32xf32>
    %169 = tpu.matmul %168, %117, %cst_48 {dimension_numbers = #tpu.dot_dimension_numbers<[1], [0], [0], [1], [0, 0, 1, 1], [], []>} : vector<2x16xf32>, vector<16x32xf32>, vector<2x32xf32> -> vector<2x32xf32>
    %cst_49 = arith.constant dense<0.000000e+00> : vector<16x2xf32>
    %170 = tpu.matmul %117, %169, %cst_49 {dimension_numbers = #tpu.dot_dimension_numbers<[1], [1], [0], [0], [0, 0, 1, 0], [], []>} : vector<16x32xf32>, vector<2x32xf32>, vector<16x2xf32> -> vector<16x2xf32>
    %c0_i32_50 = arith.constant 0 : i32
    %171 = vector.broadcast %c0_i32_50 : i32 to vector<1x2xi32>
    %172 = arith.cmpi eq, %4, %171 : vector<1x2xi32>
    %173 = vector.shape_cast %143 : vector<1x1xi32> to vector<1x1xi32>
    %174 = vector.broadcast %173 : vector<1x1xi32> to vector<1x2xi32>
    %175 = vector.shape_cast %150 : vector<1x1xi32> to vector<1x1xi32>
    %176 = vector.broadcast %175 : vector<1x1xi32> to vector<1x2xi32>
    %177 = arith.select %172, %174, %176 : vector<1x2xi1>, vector<1x2xi32>
    %178 = vector.broadcast %3 : vector<16x1xi32> to vector<16x2xi32>
    %179 = vector.broadcast %177 : vector<1x2xi32> to vector<16x2xi32>
    %180 = arith.cmpi eq, %178, %179 : vector<16x2xi32>
    %cst_51 = arith.constant 0.000000e+00 : f32
    %181 = vector.shape_cast %157 : vector<16x1xf32> to vector<16x1xf32>
    %182 = vector.broadcast %181 : vector<16x1xf32> to vector<16x2xf32>
    %183 = vector.broadcast %cst_51 : f32 to vector<16x2xf32>
    %184 = arith.select %180, %182, %183 : vector<16x2xi1>, vector<16x2xf32>
    %cst_52 = arith.constant dense<0.000000e+00> : vector<2xf32>
    %185 = vector.multi_reduction <add>, %184, %cst_52 [0] : vector<16x2xf32> to vector<2xf32>
    %186 = vector.shape_cast %185 : vector<2xf32> to vector<1x2xf32>
    %187 = vector.broadcast %cst_1 : f32 to vector<16x1xf32>
    %188 = arith.mulf %157, %187 : vector<16x1xf32>
    %189 = vector.broadcast %188 : vector<16x1xf32> to vector<16x2xf32>
    %190 = arith.mulf %170, %189 : vector<16x2xf32>
    %191 = vector.broadcast %186 : vector<1x2xf32> to vector<16x2xf32>
    %192 = arith.mulf %190, %191 : vector<16x2xf32>
    %cst_53 = arith.constant 0.000000e+00 : f32
    %193 = vector.broadcast %cst_53 : f32 to vector<16x2xf32>
    %194 = arith.select %180, %192, %193 : vector<16x2xi1>, vector<16x2xf32>
    %cst_54 = arith.constant dense<0.000000e+00> : vector<2xf32>
    %195 = vector.multi_reduction <add>, %194, %cst_54 [0] : vector<16x2xf32> to vector<2xf32>
    %196 = vector.shape_cast %195 : vector<2xf32> to vector<1x2xf32>
    %197 = math.exp %192 : vector<16x2xf32>
    %cst_55 = arith.constant dense<0.000000e+00> : vector<2xf32>
    %198 = vector.multi_reduction <add>, %197, %cst_55 [0] : vector<16x2xf32> to vector<2xf32>
    %199 = vector.shape_cast %198 : vector<2xf32> to vector<1x2xf32>
    %cst_56 = arith.constant 9.99999993E-9 : f32
    %200 = vector.broadcast %cst_56 : f32 to vector<1x2xf32>
    %201 = arith.addf %199, %200 : vector<1x2xf32>
    %202 = math.log %201 : vector<1x2xf32>
    %203 = arith.subf %196, %202 : vector<1x2xf32>
    %c0_i32_57 = arith.constant 0 : i32
    %204 = vector.broadcast %c0_i32_57 : i32 to vector<1x2xi32>
    %205 = arith.cmpi eq, %4, %204 : vector<1x2xi32>
    %cst_58 = arith.constant 0.000000e+00 : f32
    %cst_59 = arith.constant 1.000000e+00 : f32
    %206 = vector.broadcast %cst_58 : f32 to vector<1x1xf32>
    %207 = vector.broadcast %cst_59 : f32 to vector<1x1xf32>
    %208 = arith.select %151, %206, %207 : vector<1x1xi1>, vector<1x1xf32>
    %cst_60 = arith.constant 1.000000e+00 : f32
    %209 = vector.broadcast %cst_60 : f32 to vector<1x2xf32>
    %210 = vector.shape_cast %208 : vector<1x1xf32> to vector<1x1xf32>
    %211 = vector.broadcast %210 : vector<1x1xf32> to vector<1x2xf32>
    %212 = arith.select %205, %209, %211 : vector<1x2xi1>, vector<1x2xf32>
    %213 = arith.mulf %203, %212 : vector<1x2xf32>
    %cst_61 = arith.constant dense<0.000000e+00> : vector<1xf32>
    %214 = vector.multi_reduction <add>, %213, %cst_61 [1] : vector<1x2xf32> to vector<1xf32>
    %215 = vector.shape_cast %214 : vector<1xf32> to vector<1x1xf32>
    %cst_62 = arith.constant 0.000000e+00 : f32
    %216 = vector.broadcast %cst_62 : f32 to vector<1x1xf32>
    %217 = arith.select %125, %215, %216 : vector<1x1xf32>
    %cst_63 = arith.constant dense<0.000000e+00> : vector<1xf32>
    %218 = vector.multi_reduction <add>, %212, %cst_63 [1] : vector<1x2xf32> to vector<1xf32>
    %219 = vector.shape_cast %218 : vector<1xf32> to vector<1x1xf32>
    %cst_64 = arith.constant 0.000000e+00 : f32
    %220 = vector.broadcast %cst_64 : f32 to vector<1x1xf32>
    %221 = arith.select %125, %219, %220 : vector<1x1xf32>
    %222 = arith.addf %113, %217 : vector<1x1xf32>
    %223 = arith.addf %114, %221 : vector<1x1xf32>
    %c2_i32 = arith.constant 2 : i32
    %224 = arith.index_cast %c2_i32 : i32 to index
    %c0_65 = arith.constant 0 : index
    %c0_66 = arith.constant 0 : index
    %225 = vector.load %arg2[%224, %c0_65, %c0_66] : memref<5x16x32xf32, #tpu.memory_space<vmem>>, vector<1x16x32xf32>
    %226 = vector.shape_cast %225 : vector<1x16x32xf32> to vector<16x32xf32>
    %227 = arith.index_cast %c2_i32 : i32 to index
    %c0_67 = arith.constant 0 : index
    %c0_68 = arith.constant 0 : index
    %228 = vector.load %arg3[%227, %c0_67, %c0_68] : memref<5x1x16xf32, #tpu.memory_space<vmem>>, vector<1x1x16xf32>
    %229 = vector.shape_cast %228 : vector<1x1x16xf32> to vector<1x16xf32>
    %c5_i32_69 = arith.constant 5 : i32
    %230 = arith.muli %arg0, %c5_i32_69 : i32
    %231 = arith.addi %230, %c2_i32 : i32
    %232 = arith.index_cast %231 : i32 to index
    %233 = memref.load %arg1[%232] : memref<10xi32, #tpu.memory_space<smem>>
    %c0_i32_70 = arith.constant 0 : i32
    %234 = arith.cmpi sgt, %233, %c0_i32_70 : i32
    %235 = vector.broadcast %233 : i32 to vector<1x16xi32>
    %236 = arith.cmpi slt, %0, %235 : vector<1x16xi32>
    %cst_71 = arith.constant 0.000000e+00 : f32
    %237 = arith.subf %cst_71, %cst_0 : f32
    %238 = vector.broadcast %237 : f32 to vector<1x16xf32>
    %239 = arith.select %236, %229, %238 : vector<1x16xi1>, vector<1x16xf32>
    %240 = vector.broadcast %cst_0 : f32 to vector<1x16xf32>
    %241 = arith.select %236, %229, %240 : vector<1x16xi1>, vector<1x16xf32>
    %cst_72 = arith.constant dense<0xFF800000> : vector<1xf32>
    %242 = vector.multi_reduction <maximumf>, %239, %cst_72 [1] : vector<1x16xf32> to vector<1xf32>
    %243 = vector.shape_cast %242 : vector<1xf32> to vector<1x1xf32>
    %cst_73 = arith.constant dense<0x7F800000> : vector<1xf32>
    %244 = vector.multi_reduction <minimumf>, %241, %cst_73 [1] : vector<1x16xf32> to vector<1xf32>
    %245 = vector.shape_cast %244 : vector<1xf32> to vector<1x1xf32>
    %246 = vector.broadcast %243 : vector<1x1xf32> to vector<1x16xf32>
    %247 = arith.cmpf oeq, %239, %246 : vector<1x16xf32>
    %248 = arith.andi %247, %236 : vector<1x16xi1>
    %c16_i32_74 = arith.constant 16 : i32
    %249 = vector.broadcast %c16_i32_74 : i32 to vector<1x16xi32>
    %250 = arith.select %248, %0, %249 : vector<1x16xi1>, vector<1x16xi32>
    %cst_75 = arith.constant dense<2147483647> : vector<1xi32>
    %251 = vector.multi_reduction <minsi>, %250, %cst_75 [1] : vector<1x16xi32> to vector<1xi32>
    %252 = vector.shape_cast %251 : vector<1xi32> to vector<1x1xi32>
    %253 = vector.broadcast %245 : vector<1x1xf32> to vector<1x16xf32>
    %254 = arith.cmpf oeq, %241, %253 : vector<1x16xf32>
    %255 = arith.andi %254, %236 : vector<1x16xi1>
    %c16_i32_76 = arith.constant 16 : i32
    %256 = vector.broadcast %c16_i32_76 : i32 to vector<1x16xi32>
    %257 = arith.select %255, %0, %256 : vector<1x16xi1>, vector<1x16xi32>
    %cst_77 = arith.constant dense<2147483647> : vector<1xi32>
    %258 = vector.multi_reduction <minsi>, %257, %cst_77 [1] : vector<1x16xi32> to vector<1xi32>
    %259 = vector.shape_cast %258 : vector<1xi32> to vector<1x1xi32>
    %260 = arith.cmpi eq, %252, %259 : vector<1x1xi32>
    %261 = arith.mulf %226, %226 : vector<16x32xf32>
    %cst_78 = arith.constant dense<0.000000e+00> : vector<16xf32>
    %262 = vector.multi_reduction <add>, %261, %cst_78 [1] : vector<16x32xf32> to vector<16xf32>
    %263 = vector.shape_cast %262 : vector<16xf32> to vector<16x1xf32>
    %cst_79 = arith.constant 1.000000e-24 : f32
    %264 = vector.broadcast %cst_79 : f32 to vector<16x1xf32>
    %265 = arith.maximumf %263, %264 : vector<16x1xf32>
    %266 = math.rsqrt %265 : vector<16x1xf32>
    %c0_i32_80 = arith.constant 0 : i32
    %267 = vector.broadcast %c0_i32_80 : i32 to vector<2x1xi32>
    %268 = arith.cmpi eq, %2, %267 : vector<2x1xi32>
    %269 = vector.shape_cast %252 : vector<1x1xi32> to vector<1x1xi32>
    %270 = vector.broadcast %269 : vector<1x1xi32> to vector<2x1xi32>
    %271 = vector.shape_cast %259 : vector<1x1xi32> to vector<1x1xi32>
    %272 = vector.broadcast %271 : vector<1x1xi32> to vector<2x1xi32>
    %273 = arith.select %268, %270, %272 : vector<2x1xi1>, vector<2x1xi32>
    %274 = vector.broadcast %273 : vector<2x1xi32> to vector<2x16xi32>
    %275 = arith.cmpi eq, %1, %274 : vector<2x16xi32>
    %276 = arith.extui %275 : vector<2x16xi1> to vector<2x16xi32>
    %277 = arith.sitofp %276 : vector<2x16xi32> to vector<2x16xf32>
    %cst_81 = arith.constant dense<0.000000e+00> : vector<2x32xf32>
    %278 = tpu.matmul %277, %226, %cst_81 {dimension_numbers = #tpu.dot_dimension_numbers<[1], [0], [0], [1], [0, 0, 1, 1], [], []>} : vector<2x16xf32>, vector<16x32xf32>, vector<2x32xf32> -> vector<2x32xf32>
    %cst_82 = arith.constant dense<0.000000e+00> : vector<16x2xf32>
    %279 = tpu.matmul %226, %278, %cst_82 {dimension_numbers = #tpu.dot_dimension_numbers<[1], [1], [0], [0], [0, 0, 1, 0], [], []>} : vector<16x32xf32>, vector<2x32xf32>, vector<16x2xf32> -> vector<16x2xf32>
    %c0_i32_83 = arith.constant 0 : i32
    %280 = vector.broadcast %c0_i32_83 : i32 to vector<1x2xi32>
    %281 = arith.cmpi eq, %4, %280 : vector<1x2xi32>
    %282 = vector.shape_cast %252 : vector<1x1xi32> to vector<1x1xi32>
    %283 = vector.broadcast %282 : vector<1x1xi32> to vector<1x2xi32>
    %284 = vector.shape_cast %259 : vector<1x1xi32> to vector<1x1xi32>
    %285 = vector.broadcast %284 : vector<1x1xi32> to vector<1x2xi32>
    %286 = arith.select %281, %283, %285 : vector<1x2xi1>, vector<1x2xi32>
    %287 = vector.broadcast %3 : vector<16x1xi32> to vector<16x2xi32>
    %288 = vector.broadcast %286 : vector<1x2xi32> to vector<16x2xi32>
    %289 = arith.cmpi eq, %287, %288 : vector<16x2xi32>
    %cst_84 = arith.constant 0.000000e+00 : f32
    %290 = vector.shape_cast %266 : vector<16x1xf32> to vector<16x1xf32>
    %291 = vector.broadcast %290 : vector<16x1xf32> to vector<16x2xf32>
    %292 = vector.broadcast %cst_84 : f32 to vector<16x2xf32>
    %293 = arith.select %289, %291, %292 : vector<16x2xi1>, vector<16x2xf32>
    %cst_85 = arith.constant dense<0.000000e+00> : vector<2xf32>
    %294 = vector.multi_reduction <add>, %293, %cst_85 [0] : vector<16x2xf32> to vector<2xf32>
    %295 = vector.shape_cast %294 : vector<2xf32> to vector<1x2xf32>
    %296 = vector.broadcast %cst_1 : f32 to vector<16x1xf32>
    %297 = arith.mulf %266, %296 : vector<16x1xf32>
    %298 = vector.broadcast %297 : vector<16x1xf32> to vector<16x2xf32>
    %299 = arith.mulf %279, %298 : vector<16x2xf32>
    %300 = vector.broadcast %295 : vector<1x2xf32> to vector<16x2xf32>
    %301 = arith.mulf %299, %300 : vector<16x2xf32>
    %cst_86 = arith.constant 0.000000e+00 : f32
    %302 = vector.broadcast %cst_86 : f32 to vector<16x2xf32>
    %303 = arith.select %289, %301, %302 : vector<16x2xi1>, vector<16x2xf32>
    %cst_87 = arith.constant dense<0.000000e+00> : vector<2xf32>
    %304 = vector.multi_reduction <add>, %303, %cst_87 [0] : vector<16x2xf32> to vector<2xf32>
    %305 = vector.shape_cast %304 : vector<2xf32> to vector<1x2xf32>
    %306 = math.exp %301 : vector<16x2xf32>
    %cst_88 = arith.constant dense<0.000000e+00> : vector<2xf32>
    %307 = vector.multi_reduction <add>, %306, %cst_88 [0] : vector<16x2xf32> to vector<2xf32>
    %308 = vector.shape_cast %307 : vector<2xf32> to vector<1x2xf32>
    %cst_89 = arith.constant 9.99999993E-9 : f32
    %309 = vector.broadcast %cst_89 : f32 to vector<1x2xf32>
    %310 = arith.addf %308, %309 : vector<1x2xf32>
    %311 = math.log %310 : vector<1x2xf32>
    %312 = arith.subf %305, %311 : vector<1x2xf32>
    %c0_i32_90 = arith.constant 0 : i32
    %313 = vector.broadcast %c0_i32_90 : i32 to vector<1x2xi32>
    %314 = arith.cmpi eq, %4, %313 : vector<1x2xi32>
    %cst_91 = arith.constant 0.000000e+00 : f32
    %cst_92 = arith.constant 1.000000e+00 : f32
    %315 = vector.broadcast %cst_91 : f32 to vector<1x1xf32>
    %316 = vector.broadcast %cst_92 : f32 to vector<1x1xf32>
    %317 = arith.select %260, %315, %316 : vector<1x1xi1>, vector<1x1xf32>
    %cst_93 = arith.constant 1.000000e+00 : f32
    %318 = vector.broadcast %cst_93 : f32 to vector<1x2xf32>
    %319 = vector.shape_cast %317 : vector<1x1xf32> to vector<1x1xf32>
    %320 = vector.broadcast %319 : vector<1x1xf32> to vector<1x2xf32>
    %321 = arith.select %314, %318, %320 : vector<1x2xi1>, vector<1x2xf32>
    %322 = arith.mulf %312, %321 : vector<1x2xf32>
    %cst_94 = arith.constant dense<0.000000e+00> : vector<1xf32>
    %323 = vector.multi_reduction <add>, %322, %cst_94 [1] : vector<1x2xf32> to vector<1xf32>
    %324 = vector.shape_cast %323 : vector<1xf32> to vector<1x1xf32>
    %cst_95 = arith.constant 0.000000e+00 : f32
    %325 = vector.broadcast %cst_95 : f32 to vector<1x1xf32>
    %326 = arith.select %234, %324, %325 : vector<1x1xf32>
    %cst_96 = arith.constant dense<0.000000e+00> : vector<1xf32>
    %327 = vector.multi_reduction <add>, %321, %cst_96 [1] : vector<1x2xf32> to vector<1xf32>
    %328 = vector.shape_cast %327 : vector<1xf32> to vector<1x1xf32>
    %cst_97 = arith.constant 0.000000e+00 : f32
    %329 = vector.broadcast %cst_97 : f32 to vector<1x1xf32>
    %330 = arith.select %234, %328, %329 : vector<1x1xf32>
    %331 = arith.addf %222, %326 : vector<1x1xf32>
    %332 = arith.addf %223, %330 : vector<1x1xf32>
    %c3_i32 = arith.constant 3 : i32
    %333 = arith.index_cast %c3_i32 : i32 to index
    %c0_98 = arith.constant 0 : index
    %c0_99 = arith.constant 0 : index
    %334 = vector.load %arg2[%333, %c0_98, %c0_99] : memref<5x16x32xf32, #tpu.memory_space<vmem>>, vector<1x16x32xf32>
    %335 = vector.shape_cast %334 : vector<1x16x32xf32> to vector<16x32xf32>
    %336 = arith.index_cast %c3_i32 : i32 to index
    %c0_100 = arith.constant 0 : index
    %c0_101 = arith.constant 0 : index
    %337 = vector.load %arg3[%336, %c0_100, %c0_101] : memref<5x1x16xf32, #tpu.memory_space<vmem>>, vector<1x1x16xf32>
    %338 = vector.shape_cast %337 : vector<1x1x16xf32> to vector<1x16xf32>
    %c5_i32_102 = arith.constant 5 : i32
    %339 = arith.muli %arg0, %c5_i32_102 : i32
    %340 = arith.addi %339, %c3_i32 : i32
    %341 = arith.index_cast %340 : i32 to index
    %342 = memref.load %arg1[%341] : memref<10xi32, #tpu.memory_space<smem>>
    %c0_i32_103 = arith.constant 0 : i32
    %343 = arith.cmpi sgt, %342, %c0_i32_103 : i32
    %344 = vector.broadcast %342 : i32 to vector<1x16xi32>
    %345 = arith.cmpi slt, %0, %344 : vector<1x16xi32>
    %cst_104 = arith.constant 0.000000e+00 : f32
    %346 = arith.subf %cst_104, %cst_0 : f32
    %347 = vector.broadcast %346 : f32 to vector<1x16xf32>
    %348 = arith.select %345, %338, %347 : vector<1x16xi1>, vector<1x16xf32>
    %349 = vector.broadcast %cst_0 : f32 to vector<1x16xf32>
    %350 = arith.select %345, %338, %349 : vector<1x16xi1>, vector<1x16xf32>
    %cst_105 = arith.constant dense<0xFF800000> : vector<1xf32>
    %351 = vector.multi_reduction <maximumf>, %348, %cst_105 [1] : vector<1x16xf32> to vector<1xf32>
    %352 = vector.shape_cast %351 : vector<1xf32> to vector<1x1xf32>
    %cst_106 = arith.constant dense<0x7F800000> : vector<1xf32>
    %353 = vector.multi_reduction <minimumf>, %350, %cst_106 [1] : vector<1x16xf32> to vector<1xf32>
    %354 = vector.shape_cast %353 : vector<1xf32> to vector<1x1xf32>
    %355 = vector.broadcast %352 : vector<1x1xf32> to vector<1x16xf32>
    %356 = arith.cmpf oeq, %348, %355 : vector<1x16xf32>
    %357 = arith.andi %356, %345 : vector<1x16xi1>
    %c16_i32_107 = arith.constant 16 : i32
    %358 = vector.broadcast %c16_i32_107 : i32 to vector<1x16xi32>
    %359 = arith.select %357, %0, %358 : vector<1x16xi1>, vector<1x16xi32>
    %cst_108 = arith.constant dense<2147483647> : vector<1xi32>
    %360 = vector.multi_reduction <minsi>, %359, %cst_108 [1] : vector<1x16xi32> to vector<1xi32>
    %361 = vector.shape_cast %360 : vector<1xi32> to vector<1x1xi32>
    %362 = vector.broadcast %354 : vector<1x1xf32> to vector<1x16xf32>
    %363 = arith.cmpf oeq, %350, %362 : vector<1x16xf32>
    %364 = arith.andi %363, %345 : vector<1x16xi1>
    %c16_i32_109 = arith.constant 16 : i32
    %365 = vector.broadcast %c16_i32_109 : i32 to vector<1x16xi32>
    %366 = arith.select %364, %0, %365 : vector<1x16xi1>, vector<1x16xi32>
    %cst_110 = arith.constant dense<2147483647> : vector<1xi32>
    %367 = vector.multi_reduction <minsi>, %366, %cst_110 [1] : vector<1x16xi32> to vector<1xi32>
    %368 = vector.shape_cast %367 : vector<1xi32> to vector<1x1xi32>
    %369 = arith.cmpi eq, %361, %368 : vector<1x1xi32>
    %370 = arith.mulf %335, %335 : vector<16x32xf32>
    %cst_111 = arith.constant dense<0.000000e+00> : vector<16xf32>
    %371 = vector.multi_reduction <add>, %370, %cst_111 [1] : vector<16x32xf32> to vector<16xf32>
    %372 = vector.shape_cast %371 : vector<16xf32> to vector<16x1xf32>
    %cst_112 = arith.constant 1.000000e-24 : f32
    %373 = vector.broadcast %cst_112 : f32 to vector<16x1xf32>
    %374 = arith.maximumf %372, %373 : vector<16x1xf32>
    %375 = math.rsqrt %374 : vector<16x1xf32>
    %c0_i32_113 = arith.constant 0 : i32
    %376 = vector.broadcast %c0_i32_113 : i32 to vector<2x1xi32>
    %377 = arith.cmpi eq, %2, %376 : vector<2x1xi32>
    %378 = vector.shape_cast %361 : vector<1x1xi32> to vector<1x1xi32>
    %379 = vector.broadcast %378 : vector<1x1xi32> to vector<2x1xi32>
    %380 = vector.shape_cast %368 : vector<1x1xi32> to vector<1x1xi32>
    %381 = vector.broadcast %380 : vector<1x1xi32> to vector<2x1xi32>
    %382 = arith.select %377, %379, %381 : vector<2x1xi1>, vector<2x1xi32>
    %383 = vector.broadcast %382 : vector<2x1xi32> to vector<2x16xi32>
    %384 = arith.cmpi eq, %1, %383 : vector<2x16xi32>
    %385 = arith.extui %384 : vector<2x16xi1> to vector<2x16xi32>
    %386 = arith.sitofp %385 : vector<2x16xi32> to vector<2x16xf32>
    %cst_114 = arith.constant dense<0.000000e+00> : vector<2x32xf32>
    %387 = tpu.matmul %386, %335, %cst_114 {dimension_numbers = #tpu.dot_dimension_numbers<[1], [0], [0], [1], [0, 0, 1, 1], [], []>} : vector<2x16xf32>, vector<16x32xf32>, vector<2x32xf32> -> vector<2x32xf32>
    %cst_115 = arith.constant dense<0.000000e+00> : vector<16x2xf32>
    %388 = tpu.matmul %335, %387, %cst_115 {dimension_numbers = #tpu.dot_dimension_numbers<[1], [1], [0], [0], [0, 0, 1, 0], [], []>} : vector<16x32xf32>, vector<2x32xf32>, vector<16x2xf32> -> vector<16x2xf32>
    %c0_i32_116 = arith.constant 0 : i32
    %389 = vector.broadcast %c0_i32_116 : i32 to vector<1x2xi32>
    %390 = arith.cmpi eq, %4, %389 : vector<1x2xi32>
    %391 = vector.shape_cast %361 : vector<1x1xi32> to vector<1x1xi32>
    %392 = vector.broadcast %391 : vector<1x1xi32> to vector<1x2xi32>
    %393 = vector.shape_cast %368 : vector<1x1xi32> to vector<1x1xi32>
    %394 = vector.broadcast %393 : vector<1x1xi32> to vector<1x2xi32>
    %395 = arith.select %390, %392, %394 : vector<1x2xi1>, vector<1x2xi32>
    %396 = vector.broadcast %3 : vector<16x1xi32> to vector<16x2xi32>
    %397 = vector.broadcast %395 : vector<1x2xi32> to vector<16x2xi32>
    %398 = arith.cmpi eq, %396, %397 : vector<16x2xi32>
    %cst_117 = arith.constant 0.000000e+00 : f32
    %399 = vector.shape_cast %375 : vector<16x1xf32> to vector<16x1xf32>
    %400 = vector.broadcast %399 : vector<16x1xf32> to vector<16x2xf32>
    %401 = vector.broadcast %cst_117 : f32 to vector<16x2xf32>
    %402 = arith.select %398, %400, %401 : vector<16x2xi1>, vector<16x2xf32>
    %cst_118 = arith.constant dense<0.000000e+00> : vector<2xf32>
    %403 = vector.multi_reduction <add>, %402, %cst_118 [0] : vector<16x2xf32> to vector<2xf32>
    %404 = vector.shape_cast %403 : vector<2xf32> to vector<1x2xf32>
    %405 = vector.broadcast %cst_1 : f32 to vector<16x1xf32>
    %406 = arith.mulf %375, %405 : vector<16x1xf32>
    %407 = vector.broadcast %406 : vector<16x1xf32> to vector<16x2xf32>
    %408 = arith.mulf %388, %407 : vector<16x2xf32>
    %409 = vector.broadcast %404 : vector<1x2xf32> to vector<16x2xf32>
    %410 = arith.mulf %408, %409 : vector<16x2xf32>
    %cst_119 = arith.constant 0.000000e+00 : f32
    %411 = vector.broadcast %cst_119 : f32 to vector<16x2xf32>
    %412 = arith.select %398, %410, %411 : vector<16x2xi1>, vector<16x2xf32>
    %cst_120 = arith.constant dense<0.000000e+00> : vector<2xf32>
    %413 = vector.multi_reduction <add>, %412, %cst_120 [0] : vector<16x2xf32> to vector<2xf32>
    %414 = vector.shape_cast %413 : vector<2xf32> to vector<1x2xf32>
    %415 = math.exp %410 : vector<16x2xf32>
    %cst_121 = arith.constant dense<0.000000e+00> : vector<2xf32>
    %416 = vector.multi_reduction <add>, %415, %cst_121 [0] : vector<16x2xf32> to vector<2xf32>
    %417 = vector.shape_cast %416 : vector<2xf32> to vector<1x2xf32>
    %cst_122 = arith.constant 9.99999993E-9 : f32
    %418 = vector.broadcast %cst_122 : f32 to vector<1x2xf32>
    %419 = arith.addf %417, %418 : vector<1x2xf32>
    %420 = math.log %419 : vector<1x2xf32>
    %421 = arith.subf %414, %420 : vector<1x2xf32>
    %c0_i32_123 = arith.constant 0 : i32
    %422 = vector.broadcast %c0_i32_123 : i32 to vector<1x2xi32>
    %423 = arith.cmpi eq, %4, %422 : vector<1x2xi32>
    %cst_124 = arith.constant 0.000000e+00 : f32
    %cst_125 = arith.constant 1.000000e+00 : f32
    %424 = vector.broadcast %cst_124 : f32 to vector<1x1xf32>
    %425 = vector.broadcast %cst_125 : f32 to vector<1x1xf32>
    %426 = arith.select %369, %424, %425 : vector<1x1xi1>, vector<1x1xf32>
    %cst_126 = arith.constant 1.000000e+00 : f32
    %427 = vector.broadcast %cst_126 : f32 to vector<1x2xf32>
    %428 = vector.shape_cast %426 : vector<1x1xf32> to vector<1x1xf32>
    %429 = vector.broadcast %428 : vector<1x1xf32> to vector<1x2xf32>
    %430 = arith.select %423, %427, %429 : vector<1x2xi1>, vector<1x2xf32>
    %431 = arith.mulf %421, %430 : vector<1x2xf32>
    %cst_127 = arith.constant dense<0.000000e+00> : vector<1xf32>
    %432 = vector.multi_reduction <add>, %431, %cst_127 [1] : vector<1x2xf32> to vector<1xf32>
    %433 = vector.shape_cast %432 : vector<1xf32> to vector<1x1xf32>
    %cst_128 = arith.constant 0.000000e+00 : f32
    %434 = vector.broadcast %cst_128 : f32 to vector<1x1xf32>
    %435 = arith.select %343, %433, %434 : vector<1x1xf32>
    %cst_129 = arith.constant dense<0.000000e+00> : vector<1xf32>
    %436 = vector.multi_reduction <add>, %430, %cst_129 [1] : vector<1x2xf32> to vector<1xf32>
    %437 = vector.shape_cast %436 : vector<1xf32> to vector<1x1xf32>
    %cst_130 = arith.constant 0.000000e+00 : f32
    %438 = vector.broadcast %cst_130 : f32 to vector<1x1xf32>
    %439 = arith.select %343, %437, %438 : vector<1x1xf32>
    %440 = arith.addf %331, %435 : vector<1x1xf32>
    %441 = arith.addf %332, %439 : vector<1x1xf32>
    %c4_i32 = arith.constant 4 : i32
    %442 = arith.index_cast %c4_i32 : i32 to index
    %c0_131 = arith.constant 0 : index
    %c0_132 = arith.constant 0 : index
    %443 = vector.load %arg2[%442, %c0_131, %c0_132] : memref<5x16x32xf32, #tpu.memory_space<vmem>>, vector<1x16x32xf32>
    %444 = vector.shape_cast %443 : vector<1x16x32xf32> to vector<16x32xf32>
    %445 = arith.index_cast %c4_i32 : i32 to index
    %c0_133 = arith.constant 0 : index
    %c0_134 = arith.constant 0 : index
    %446 = vector.load %arg3[%445, %c0_133, %c0_134] : memref<5x1x16xf32, #tpu.memory_space<vmem>>, vector<1x1x16xf32>
    %447 = vector.shape_cast %446 : vector<1x1x16xf32> to vector<1x16xf32>
    %c5_i32_135 = arith.constant 5 : i32
    %448 = arith.muli %arg0, %c5_i32_135 : i32
    %449 = arith.addi %448, %c4_i32 : i32
    %450 = arith.index_cast %449 : i32 to index
    %451 = memref.load %arg1[%450] : memref<10xi32, #tpu.memory_space<smem>>
    %c0_i32_136 = arith.constant 0 : i32
    %452 = arith.cmpi sgt, %451, %c0_i32_136 : i32
    %453 = vector.broadcast %451 : i32 to vector<1x16xi32>
    %454 = arith.cmpi slt, %0, %453 : vector<1x16xi32>
    %cst_137 = arith.constant 0.000000e+00 : f32
    %455 = arith.subf %cst_137, %cst_0 : f32
    %456 = vector.broadcast %455 : f32 to vector<1x16xf32>
    %457 = arith.select %454, %447, %456 : vector<1x16xi1>, vector<1x16xf32>
    %458 = vector.broadcast %cst_0 : f32 to vector<1x16xf32>
    %459 = arith.select %454, %447, %458 : vector<1x16xi1>, vector<1x16xf32>
    %cst_138 = arith.constant dense<0xFF800000> : vector<1xf32>
    %460 = vector.multi_reduction <maximumf>, %457, %cst_138 [1] : vector<1x16xf32> to vector<1xf32>
    %461 = vector.shape_cast %460 : vector<1xf32> to vector<1x1xf32>
    %cst_139 = arith.constant dense<0x7F800000> : vector<1xf32>
    %462 = vector.multi_reduction <minimumf>, %459, %cst_139 [1] : vector<1x16xf32> to vector<1xf32>
    %463 = vector.shape_cast %462 : vector<1xf32> to vector<1x1xf32>
    %464 = vector.broadcast %461 : vector<1x1xf32> to vector<1x16xf32>
    %465 = arith.cmpf oeq, %457, %464 : vector<1x16xf32>
    %466 = arith.andi %465, %454 : vector<1x16xi1>
    %c16_i32_140 = arith.constant 16 : i32
    %467 = vector.broadcast %c16_i32_140 : i32 to vector<1x16xi32>
    %468 = arith.select %466, %0, %467 : vector<1x16xi1>, vector<1x16xi32>
    %cst_141 = arith.constant dense<2147483647> : vector<1xi32>
    %469 = vector.multi_reduction <minsi>, %468, %cst_141 [1] : vector<1x16xi32> to vector<1xi32>
    %470 = vector.shape_cast %469 : vector<1xi32> to vector<1x1xi32>
    %471 = vector.broadcast %463 : vector<1x1xf32> to vector<1x16xf32>
    %472 = arith.cmpf oeq, %459, %471 : vector<1x16xf32>
    %473 = arith.andi %472, %454 : vector<1x16xi1>
    %c16_i32_142 = arith.constant 16 : i32
    %474 = vector.broadcast %c16_i32_142 : i32 to vector<1x16xi32>
    %475 = arith.select %473, %0, %474 : vector<1x16xi1>, vector<1x16xi32>
    %cst_143 = arith.constant dense<2147483647> : vector<1xi32>
    %476 = vector.multi_reduction <minsi>, %475, %cst_143 [1] : vector<1x16xi32> to vector<1xi32>
    %477 = vector.shape_cast %476 : vector<1xi32> to vector<1x1xi32>
    %478 = arith.cmpi eq, %470, %477 : vector<1x1xi32>
    %479 = arith.mulf %444, %444 : vector<16x32xf32>
    %cst_144 = arith.constant dense<0.000000e+00> : vector<16xf32>
    %480 = vector.multi_reduction <add>, %479, %cst_144 [1] : vector<16x32xf32> to vector<16xf32>
    %481 = vector.shape_cast %480 : vector<16xf32> to vector<16x1xf32>
    %cst_145 = arith.constant 1.000000e-24 : f32
    %482 = vector.broadcast %cst_145 : f32 to vector<16x1xf32>
    %483 = arith.maximumf %481, %482 : vector<16x1xf32>
    %484 = math.rsqrt %483 : vector<16x1xf32>
    %c0_i32_146 = arith.constant 0 : i32
    %485 = vector.broadcast %c0_i32_146 : i32 to vector<2x1xi32>
    %486 = arith.cmpi eq, %2, %485 : vector<2x1xi32>
    %487 = vector.shape_cast %470 : vector<1x1xi32> to vector<1x1xi32>
    %488 = vector.broadcast %487 : vector<1x1xi32> to vector<2x1xi32>
    %489 = vector.shape_cast %477 : vector<1x1xi32> to vector<1x1xi32>
    %490 = vector.broadcast %489 : vector<1x1xi32> to vector<2x1xi32>
    %491 = arith.select %486, %488, %490 : vector<2x1xi1>, vector<2x1xi32>
    %492 = vector.broadcast %491 : vector<2x1xi32> to vector<2x16xi32>
    %493 = arith.cmpi eq, %1, %492 : vector<2x16xi32>
    %494 = arith.extui %493 : vector<2x16xi1> to vector<2x16xi32>
    %495 = arith.sitofp %494 : vector<2x16xi32> to vector<2x16xf32>
    %cst_147 = arith.constant dense<0.000000e+00> : vector<2x32xf32>
    %496 = tpu.matmul %495, %444, %cst_147 {dimension_numbers = #tpu.dot_dimension_numbers<[1], [0], [0], [1], [0, 0, 1, 1], [], []>} : vector<2x16xf32>, vector<16x32xf32>, vector<2x32xf32> -> vector<2x32xf32>
    %cst_148 = arith.constant dense<0.000000e+00> : vector<16x2xf32>
    %497 = tpu.matmul %444, %496, %cst_148 {dimension_numbers = #tpu.dot_dimension_numbers<[1], [1], [0], [0], [0, 0, 1, 0], [], []>} : vector<16x32xf32>, vector<2x32xf32>, vector<16x2xf32> -> vector<16x2xf32>
    %c0_i32_149 = arith.constant 0 : i32
    %498 = vector.broadcast %c0_i32_149 : i32 to vector<1x2xi32>
    %499 = arith.cmpi eq, %4, %498 : vector<1x2xi32>
    %500 = vector.shape_cast %470 : vector<1x1xi32> to vector<1x1xi32>
    %501 = vector.broadcast %500 : vector<1x1xi32> to vector<1x2xi32>
    %502 = vector.shape_cast %477 : vector<1x1xi32> to vector<1x1xi32>
    %503 = vector.broadcast %502 : vector<1x1xi32> to vector<1x2xi32>
    %504 = arith.select %499, %501, %503 : vector<1x2xi1>, vector<1x2xi32>
    %505 = vector.broadcast %3 : vector<16x1xi32> to vector<16x2xi32>
    %506 = vector.broadcast %504 : vector<1x2xi32> to vector<16x2xi32>
    %507 = arith.cmpi eq, %505, %506 : vector<16x2xi32>
    %cst_150 = arith.constant 0.000000e+00 : f32
    %508 = vector.shape_cast %484 : vector<16x1xf32> to vector<16x1xf32>
    %509 = vector.broadcast %508 : vector<16x1xf32> to vector<16x2xf32>
    %510 = vector.broadcast %cst_150 : f32 to vector<16x2xf32>
    %511 = arith.select %507, %509, %510 : vector<16x2xi1>, vector<16x2xf32>
    %cst_151 = arith.constant dense<0.000000e+00> : vector<2xf32>
    %512 = vector.multi_reduction <add>, %511, %cst_151 [0] : vector<16x2xf32> to vector<2xf32>
    %513 = vector.shape_cast %512 : vector<2xf32> to vector<1x2xf32>
    %514 = vector.broadcast %cst_1 : f32 to vector<16x1xf32>
    %515 = arith.mulf %484, %514 : vector<16x1xf32>
    %516 = vector.broadcast %515 : vector<16x1xf32> to vector<16x2xf32>
    %517 = arith.mulf %497, %516 : vector<16x2xf32>
    %518 = vector.broadcast %513 : vector<1x2xf32> to vector<16x2xf32>
    %519 = arith.mulf %517, %518 : vector<16x2xf32>
    %cst_152 = arith.constant 0.000000e+00 : f32
    %520 = vector.broadcast %cst_152 : f32 to vector<16x2xf32>
    %521 = arith.select %507, %519, %520 : vector<16x2xi1>, vector<16x2xf32>
    %cst_153 = arith.constant dense<0.000000e+00> : vector<2xf32>
    %522 = vector.multi_reduction <add>, %521, %cst_153 [0] : vector<16x2xf32> to vector<2xf32>
    %523 = vector.shape_cast %522 : vector<2xf32> to vector<1x2xf32>
    %524 = math.exp %519 : vector<16x2xf32>
    %cst_154 = arith.constant dense<0.000000e+00> : vector<2xf32>
    %525 = vector.multi_reduction <add>, %524, %cst_154 [0] : vector<16x2xf32> to vector<2xf32>
    %526 = vector.shape_cast %525 : vector<2xf32> to vector<1x2xf32>
    %cst_155 = arith.constant 9.99999993E-9 : f32
    %527 = vector.broadcast %cst_155 : f32 to vector<1x2xf32>
    %528 = arith.addf %526, %527 : vector<1x2xf32>
    %529 = math.log %528 : vector<1x2xf32>
    %530 = arith.subf %523, %529 : vector<1x2xf32>
    %c0_i32_156 = arith.constant 0 : i32
    %531 = vector.broadcast %c0_i32_156 : i32 to vector<1x2xi32>
    %532 = arith.cmpi eq, %4, %531 : vector<1x2xi32>
    %cst_157 = arith.constant 0.000000e+00 : f32
    %cst_158 = arith.constant 1.000000e+00 : f32
    %533 = vector.broadcast %cst_157 : f32 to vector<1x1xf32>
    %534 = vector.broadcast %cst_158 : f32 to vector<1x1xf32>
    %535 = arith.select %478, %533, %534 : vector<1x1xi1>, vector<1x1xf32>
    %cst_159 = arith.constant 1.000000e+00 : f32
    %536 = vector.broadcast %cst_159 : f32 to vector<1x2xf32>
    %537 = vector.shape_cast %535 : vector<1x1xf32> to vector<1x1xf32>
    %538 = vector.broadcast %537 : vector<1x1xf32> to vector<1x2xf32>
    %539 = arith.select %532, %536, %538 : vector<1x2xi1>, vector<1x2xf32>
    %540 = arith.mulf %530, %539 : vector<1x2xf32>
    %cst_160 = arith.constant dense<0.000000e+00> : vector<1xf32>
    %541 = vector.multi_reduction <add>, %540, %cst_160 [1] : vector<1x2xf32> to vector<1xf32>
    %542 = vector.shape_cast %541 : vector<1xf32> to vector<1x1xf32>
    %cst_161 = arith.constant 0.000000e+00 : f32
    %543 = vector.broadcast %cst_161 : f32 to vector<1x1xf32>
    %544 = arith.select %452, %542, %543 : vector<1x1xf32>
    %cst_162 = arith.constant dense<0.000000e+00> : vector<1xf32>
    %545 = vector.multi_reduction <add>, %539, %cst_162 [1] : vector<1x2xf32> to vector<1xf32>
    %546 = vector.shape_cast %545 : vector<1xf32> to vector<1x1xf32>
    %cst_163 = arith.constant 0.000000e+00 : f32
    %547 = vector.broadcast %cst_163 : f32 to vector<1x1xf32>
    %548 = arith.select %452, %546, %547 : vector<1x1xf32>
    %549 = arith.addf %440, %544 : vector<1x1xf32>
    %550 = arith.addf %441, %548 : vector<1x1xf32>
    %c5_i32_164 = arith.constant 5 : i32
    %cst_165 = arith.constant 1.000000e+00 : f32
    %551 = vector.broadcast %cst_165 : f32 to vector<1x8x128xf32>
    %552 = tpu.iota {dimensions = array<i32: 1>} : vector<1x8x128xi32>
    %c0_i32_166 = arith.constant 0 : i32
    %553 = vector.broadcast %c0_i32_166 : i32 to vector<1x8x128xi32>
    %554 = arith.cmpi eq, %552, %553 : vector<1x8x128xi32>
    %555 = vector.shape_cast %549 : vector<1x1xf32> to vector<1x1x1xf32>
    %556 = vector.broadcast %555 : vector<1x1x1xf32> to vector<1x8x128xf32>
    %557 = arith.mulf %556, %551 : vector<1x8x128xf32>
    %c1_i32_167 = arith.constant 1 : i32
    %558 = vector.broadcast %c1_i32_167 : i32 to vector<1x8x128xi32>
    %559 = arith.cmpi eq, %552, %558 : vector<1x8x128xi32>
    %560 = vector.shape_cast %550 : vector<1x1xf32> to vector<1x1x1xf32>
    %561 = vector.broadcast %560 : vector<1x1x1xf32> to vector<1x8x128xf32>
    %562 = arith.mulf %561, %551 : vector<1x8x128xf32>
    %cst_168 = arith.constant 0.000000e+00 : f32
    %563 = vector.broadcast %cst_168 : f32 to vector<1x8x128xf32>
    %564 = arith.select %559, %562, %563 : vector<1x8x128xi1>, vector<1x8x128xf32>
    %565 = arith.select %554, %557, %564 : vector<1x8x128xi1>, vector<1x8x128xf32>
    %c0_169 = arith.constant 0 : index
    %c0_170 = arith.constant 0 : index
    %c0_171 = arith.constant 0 : index
    %566 = vector.load %arg4[%c0_169, %c0_170, %c0_171] : memref<1x8x128xf32, #tpu.memory_space<vmem>>, vector<1x8x128xf32>
    tpu.vector_store %arg4[%c0_169, %c0_170, %c0_171], %565 {strides = array<i32>} : memref<1x8x128xf32, #tpu.memory_space<vmem>>, vector<1x8x128xf32>,
    return
  }
  func.func @transform_0(%arg0: i32, %arg1: memref<10xi32, #tpu.memory_space<smem>>) -> (i32, i32, i32) {
    %c0_i32 = arith.constant 0 : i32
    %c0_i32_0 = arith.constant 0 : i32
    %c0_i32_1 = arith.constant 0 : i32
    return %arg0, %c0_i32, %c0_i32_0 : i32, i32, i32
  }
  func.func @transform_1(%arg0: i32, %arg1: memref<10xi32, #tpu.memory_space<smem>>) -> (i32, i32, i32) {
    %c0_i32 = arith.constant 0 : i32
    %c0_i32_0 = arith.constant 0 : i32
    %c0_i32_1 = arith.constant 0 : i32
    return %arg0, %c0_i32, %c0_i32_0 : i32, i32, i32
  }
  func.func @transform_2(%arg0: i32, %arg1: memref<10xi32, #tpu.memory_space<smem>>) -> (i32, i32, i32) {
    %c0_i32 = arith.constant 0 : i32
    %c0_i32_0 = arith.constant 0 : i32
    %c0_i32_1 = arith.constant 0 : i32
    return %arg0, %c0_i32, %c0_i32_0 : i32, i32, i32
  }
}

</mosaic_0001>

<bundles_post_ra>
// kernel: tpu_custom_call.1
= control target key start
LH: loop header
LB: loop body
LE: loop exit
PB: predicated region body
PF: predicated region fallthrough
CT: control target
= control target key end

     0   :  { %s3243_s0 = inlined_call_operand.hbm [shape: s32[10], index: 0, kind: input, shape index: {}]   ;;  %s3244_s1 = inlined_call_operand.hbm [shape: f32[10,16,32], index: 1, kind: input, shape index: {}]   ;;  %s3245_s2 = inlined_call_operand.hbm [shape: f32[10,1,16], index: 2, kind: input, shape index: {}]   ;;  %s3246_s3 = inlined_call_operand.hbm [shape: f32[2,8,128], index: 3, kind: output, shape index: {}]  }
   0x1   :  { %s2131_s14 = scalar_lea.hbm %s3243_s0, 16 }
   0x2   :  { %p2132_p0 = scmp.ne.s32.totalorder %s3243_s0, %s2131_s14  ;;  %p2135_p1 = scmp.lt.u32.totalorder %s2131_s14, %s3243_s0 }
   0x4   :  { %p2137_p2 = pnand %p2135_p1, %p2132_p0 }
   0x6   :  { %2140 = shalt.err (!%p2137_p2)  }
   0x7   :  { %s2275_s19 = smov [#allocation3]  }
   0x8   :  { %9 = dma.hbm_to_smem %s3243_s0, 16, %s2275_s19, [#allocation2] }
   0x9   :  { %2245 = dma.done.wait [#allocation2], 16 }
   0xa   :  { %2246 = vsyncadd [#allocation2], 4294967280 }
   0xb   :  { %11 = sfence }
   0xc   :  { %12 = vsyncpa [#allocation5], 0 }
   0xd   :  { %14 = vsyncpa [#allocation5 + $0x1], 0 }
   0xe   :  { %15 = vsyncpa [#allocation8], 0 }
   0xf   :  { %17 = vsyncpa [#allocation8 + $0x1], 0 }
  0x10   :  { %18 = vsyncpa [#allocation6], 0 }
  0x11   :  { %20 = vsyncpa [#allocation6 + $0x1], 0  ;;  %s2319_s22 = smov 0   ;;  %s2321_s23 = smov 0  }
  0x12   :  { %s2323_s24 = smov 0   ;;  %s2325_s25 = smov 0  }
  0x13 LB: > { %s2340_s0 = sadd.s32 4294967295, %s2273_s25   ;;  %s1859_s26 = sadd.s32 4294967294, %s2273_s25   ;;  %s2273_s25 = sphi %s2325_s25, %s3281_s25   ;;  %s2269_s24 = sphi %s2323_s24, %s3280_s24   ;;  %s2265_s23 = sphi %s2321_s23, %s3279_s23   ;;  %s2261_s22 = sphi %s2319_s22, %s3278_s22  }
  0x14   : > { %s2344_s27 = sadd.s32 1, %s2273_s25   ;;  %s33_s28 = sadd.s32 1, %s2269_s24 }
  0x15   : > { %s30_s29 = ssub.s32 %s2273_s25, %s2344_s27  ;;  %p40_p3 = scmp.ne.s32.totalorder %s2269_s24, %s2265_s23 }
  0x16   : > { %p31_p4 = scmp.eq.s32.totalorder %s30_s29, 0  ;;  %p41_p5 = scmp.eq.s32.totalorder %s2273_s25, 0 }
  0x17   : > { %p46_p6 = scmp.ne.s32.totalorder %s2265_s23, %s2261_s22  ;;  %p47_p7 = scmp.eq.s32.totalorder %s2340_s0, 0 }
  0x18   : > { %s2356_s30 = scalar_select %p31_p4, %s2269_s24, %s33_s28  }
  0x19   : > { %p42_p8 = por %p41_p5, %p40_p3  ;;  %p2358_p9 = por %p47_p7, %p46_p6 }
  0x1a   : > { %p96_p10 = scmp.eq.s32.totalorder %s2340_s0, 1  ;;  %p102_p11 = scmp.eq.s32.totalorder %s1859_s26, 1 }
  0x1b   : > { %s3249_s4 = scalar_select %p2358_p9, 1, 0 }
  0x1c   : > { %p2038_p13 = scmp.lt.s32.totalorder %s2273_s25, 2  ;;  %p2365_p0 = por %p96_p10, %p40_p3 }
  0x1d   : > { %p2369_p1 = por %p102_p11, %p46_p6  ;;  %s2374_s7 = sand.u32 1, %s2269_s24  }
  0x1e   : > { %s3250_s5 = scalar_select %p2365_p0, 1, 0 }
  0x1f   : > { %s3251_s6 = scalar_select %p2369_p1, 1, 0 }
  0x20   : > { %s1911_s8 = smul.u32 1280, %s2273_s25  ;;  %p2383_p2 = pnand %p2038_p13, %p42_p8 }
  0x21   : > { %s2017_s9 = smul.u32 80, %s2374_s7  ;;  %s123_s16 = scalar_lea.sflag [#allocation5], %s2374_s7 }
  0x22   : > { %s2381_s12 = scalar_lea.hbm %s3244_s1, %s1911_s8  ;;  %p2143_p4 = pneg %p2383_p2 }
  0x23   : > { %s126_s14 = scalar_lea.vmem [#allocation4], %s2017_s9  ;;  %s2141_s17 = scalar_lea.hbm %s2381_s12, 1280 }
  0x24   : > { %s134_s15 = sshll.u32 %s126_s14, 4  ;;  %p2142_p3 = scmp.ne.s32.totalorder %s2381_s12, %s2141_s17  ;;  %s2387_s15 = int_to_ptr.vmem [resolvable:$true] %s134_s15 }
  0x25   : > { %s2146_s20 = scalar_lea.hbm %s3244_s1, 2560  ;;  %p2147_p7 = scmp.lt.u32.totalorder %s2381_s12, %s3244_s1 }
  0x26   : > { %p2144_p5 = pnand %p2143_p4, %p2142_p3  ;;  %p2148_p8 = scmp.lt.u32.totalorder %s2146_s20, %s2141_s17 }
  0x27   : > { %p2150_p11 = scmp.lt.u32.totalorder %s2141_s17, %s2381_s12 }
  0x28   : > { %p2145_p6 = pneg %p2144_p5  ;;  %p2149_p10 = por %p2148_p8, %p2147_p7 }
  0x2a   : > { %p2151_p13 = por %p2150_p11, %p2149_p10 }
  0x2c   : > { %p2152_p12 = pnand %p2151_p13, %p2145_p6 }
  0x2e   : > { %2155 = shalt.err (!%p2152_p12)
}
  0x2f   : > { %s2156_s28 = scalar_lea.vmem %s2387_s15, 1280  ;;  %s2276_s29 = smov [#allocation4]  }
  0x30   : > { %p2157_p3 = scmp.ne.s32.totalorder %s2387_s15, %s2156_s28  ;;  %s2161_s8 = sshll.u32 %s2276_s29, 4  ;;  %s2162_s8 = int_to_ptr.vmem [resolvable:$false] %s2161_s8 }
  0x31   : > { %s2163_s9 = scalar_lea.vmem %s2162_s8, 2560  ;;  %p2164_p0 = scmp.lt.s32.totalorder %s2387_s15, %s2162_s8 }
  0x32   : > { %p2159_p5 = pnand %p2157_p3, %p2143_p4  ;;  %p2165_p7 = scmp.lt.s32.totalorder %s2163_s9, %s2156_s28 }
  0x34   : > { %p2160_p1 = pneg %p2159_p5  ;;  %p2166_p8 = por %p2165_p7, %p2164_p0 }
  0x36   : > { %p2167_p10 = pnand %p2166_p8, %p2160_p1 }
  0x38   : > { %2170 = shalt.err (!%p2167_p10)
}
  0x39   : > { %s2277_s10 = smov 128   ;;  %s2278_s11 = smov 8  }
  0x3a   : > { %2030 = dma.hbm_to_vmem [thread:$0]  (!%p2383_p2), %s2381_s12, 1280, %s2387_s15, %s123_s16, %s2277_s10, %s2277_s10, %s2278_s11  }
  0x3b   : > { %p1865_p12 = scmp.ge.s32.totalorder %s2273_s25, 1  ;;  %p163_p6 = scmp.lt.s32.totalorder %s2273_s25, 3 }
  0x3c   : > { %s2018_s14 = smul.u32 5, %s2374_s7  ;;  %s145_s12 = scalar_lea.sflag [#allocation8], %s2374_s7 }
  0x3d   : > { %p2420_p0 = pnand %p1865_p12, %p163_p6  ;;  %s1910_s18 = smul.u32 80, %s2273_s25 }
  0x3e   : > { %s148_s26 = scalar_lea.vmem [#allocation7], %s2018_s14  ;;  %s2176_s8 = scalar_lea.hbm %s3245_s2, 160 }
  0x3f   : > { %s2428_s21 = scalar_lea.hbm %s3245_s2, %s1910_s18  ;;  %s155_s28 = sshll.u32 %s148_s26, 4  ;;  %s2430_s28 = int_to_ptr.vmem [resolvable:$true] %s155_s28 }
  0x40   : > { %s2171_s15 = scalar_lea.hbm %s2428_s21, 80  ;;  %p2177_p3 = scmp.lt.u32.totalorder %s2428_s21, %s3245_s2 }
  0x41   : > { %p2172_p1 = scmp.ne.s32.totalorder %s2428_s21, %s2171_s15  ;;  %p2178_p5 = scmp.lt.u32.totalorder %s2176_s8, %s2171_s15 }
  0x42   : > { %p2180_p8 = scmp.lt.u32.totalorder %s2171_s15, %s2428_s21 }
  0x43   : > { %p2174_p11 = pnand %p2172_p1, %p2143_p4  ;;  %p2179_p7 = por %p2178_p5, %p2177_p3 }
  0x45   : > { %p2175_p13 = pneg %p2174_p11  ;;  %p2181_p10 = por %p2180_p8, %p2179_p7 }
  0x47   : > { %p2182_p12 = pnand %p2181_p10, %p2175_p13 }
  0x49   : > { %2185 = shalt.err (!%p2182_p12)
}
  0x4a   : > { %s2186_s11 = scalar_lea.vmem %s2430_s28, 80  ;;  %s2279_s14 = smov [#allocation7]  }
  0x4b   : > { %p2187_p6 = scmp.ne.s32.totalorder %s2430_s28, %s2186_s11  ;;  %s2191_s18 = sshll.u32 %s2279_s14, 4  ;;  %s2192_s18 = int_to_ptr.vmem [resolvable:$false] %s2191_s18 }
  0x4c   : > { %s2193_s19 = scalar_lea.vmem %s2192_s18, 160  ;;  %p2194_p9 = scmp.lt.s32.totalorder %s2430_s28, %s2192_s18 }
  0x4d   : > { %p2189_p1 = pnand %p2187_p6, %p2143_p4  ;;  %p2195_p3 = scmp.lt.s32.totalorder %s2193_s19, %s2186_s11 }
  0x4f   : > { %p2190_p11 = pneg %p2189_p1  ;;  %p2196_p5 = por %p2195_p3, %p2194_p9 }
  0x51   : > { %p2197_p7 = pnand %p2196_p5, %p2190_p11 }
  0x53   : > { %2200 = shalt.err (!%p2197_p7)
}
  0x54   : > { %s2280_s20 = smov 16   ;;  %s2281_s26 = smov 1  }
  0x55   : > { %2033 = dma.hbm_to_vmem [thread:$0]  (!%p2383_p2), %s2428_s21, 80, %s2430_s28, %s145_s12, %s2280_s20, %s2280_s20, %s2281_s26  }
  0x56   : > { %167 = sbr.rel (%p2420_p0) target bundleno = 1220 (0x4c4), region = 28  ;;  %s2461_s15 = sand.u32 (!%p2420_p0), 1, %s2265_s23  }
  0x57   : > { %s2019_s16 = smul.u32 (!%p2420_p0), 80, %s2461_s15  ;;  %s170_s29 = scalar_lea.sflag (!%p2420_p0), [#allocation5], %s2461_s15 }
  0x58   : > { %p3254_p9 = scmp.ne.s32.totalorder (!%p2420_p0), %s3249_s4, 0 }
  0x59   : > { %s2465_s8 = scalar_lea.vmem (!%p2420_p0), [#allocation4], %s2019_s16 }
  0x5d   : > { %2248 = dma.done.wait (%p3254_p9), %s170_s29, 1280  }
  0x5e   : > { %2250 = vsyncadd (%p3254_p9), %s170_s29, 4294966016  ;;  %s2020_s7 = smul.u32 5, %s2461_s15  ;;  %s179_s13 = scalar_lea.sflag [#allocation8], %s2461_s15 }
  0x60   : > { %s2473_s17 = scalar_lea.vmem [#allocation7], %s2020_s7 }
  0x61   : > { %2252 = dma.done.wait (%p3254_p9), %s179_s13, 80  }
  0x62   : > { %2254 = vsyncadd (%p3254_p9), %s179_s13, 4294967216  ;;  %s218_s21 = smul.u32 5, %s2340_s0  ;;  %v210_v0 = vlaneseq  ;;  %v217_v2 = vld [vmem:[%s2473_s17] sm:$0x1]  ;;  %vm225_vm0 = vcmask 122880   ;;  %s1866_s7 = sshll.u32 %s2461_s15, 3 }
  0x63   : > { %v1874_v4 = vld [vmem:[%s2473_s17 + $0x1] sm:$0x1]  ;;  %v1882_v10 = vld [vmem:[%s2473_s17 + $0x2] sm:$0x1]  ;;  %v1890_v22 = vld [vmem:[%s2473_s17 + $0x3] sm:$0x1] }
  0x64   : > { %s2480_s28 = sld [smem:[#allocation3 + %s218_s21]]  ;;  %s529_s12 = sadd.s32 1, %s218_s21  ;;  %v2487_v1 = vand.u32 127, %v210_v0  ;;  %v1898_v29 = vld [vmem:[%s2473_s17 + $0x4] sm:$0x1] }
  0x65   : > { %s2482_s9 = sld [smem:[#allocation3 + %s529_s12]]  ;;  %s833_s10 = sadd.s32 2, %s218_s21 }
  0x66   : > { %s2484_s11 = sld [smem:[#allocation3 + %s833_s10]]  ;;  %s1137_s14 = sadd.s32 3, %s218_s21 }
  0x67   : > { %s2489_s4 = sld [smem:[#allocation3 + %s1137_s14]]  ;;  %s1441_s18 = sadd.s32 4, %s218_s21 }
  0x68   : > { %s2494_s19 = sld [smem:[#allocation3 + %s1441_s18]]  ;;  %s1905_s13 = sshll.u32 %s2340_s0, 7 }
  0x69   : > { %s207_s17 = scalar_lea.vmem [#allocation9], %s1866_s7  ;;  %s1753_s0 = scalar_lea.sflag [#allocation6], %s2461_s15 }
  0x6a   : > { %v221_v3 = vstv %s2480_s28  ;;  %p220_p2 = scmp.gt.s32.totalorder %s2480_s28, 0  ;;  %s1766_s21 = sshll.u32 %s207_s17, 4  ;;  %s3199_s21 = int_to_ptr.vmem [resolvable:$true] %s1766_s21 }
  0x6b   : > { %vm2497_vm1 = vcmp.lt.s32.totalorder %v2487_v1, %v221_v3  ;;  %v532_v6 = vstv %s2482_s9  ;;  %p531_p4 = scmp.gt.s32.totalorder %s2482_s9, 0  ;;  %s3197_s9 = scalar_lea.hbm %s3246_s3, %s1905_s13 }
  0x6c   : > { %v223_v7 = vsel %vm2497_vm1, %v217_v2, -1e+30  ;;  %vm2505_vm2 = vcmp.lt.s32.totalorder %v2487_v1, %v532_v6  ;;  %v224_v9 = vsel %vm2497_vm1, %v217_v2, 1e+30  ;;  %v836_v11 = vstv %s2484_s11  ;;  %p835_p0 = scmp.gt.s32.totalorder %s2484_s11, 0  ;;  %s2201_s10 = scalar_lea.vmem %s3199_s21, 128 }
  0x6d   : > { %v226_v12 = vsel %vm225_vm0, %v223_v7, -inf  ;;  %v534_v13 = vsel %vm2505_vm2, %v1874_v4, -1e+30  ;;  %v535_v14 = vsel %vm2505_vm2, %v1874_v4, 1e+30  ;;  %vm2520_vm3 = vcmp.lt.s32.totalorder %v2487_v1, %v836_v11  ;;  %p1139_p13 = scmp.gt.s32.totalorder %s2489_s4, 0  ;;  %p2202_p10 = scmp.ne.s32.totalorder %s3199_s21, %s2201_s10 }
  0x6e   : > { %227 = vmax.xlane.f32.xlu0 %v226_v12  ;;  %v536_v15 = vsel %vm225_vm0, %v534_v13, -inf  ;;  %v1140_v17 = vstv %s2489_s4  ;;  %v229_v18 = vsel %vm225_vm0, %v224_v9, inf  ;;  %v539_v19 = vsel %vm225_vm0, %v535_v14, inf  ;;  %s514_s20 = scalar_select %p220_p2, 1, 0 }
  0x6f   : > { %537 = vmax.xlane.f32.xlu1 %v536_v15  ;;  %v838_v20 = vsel %vm2520_vm3, %v1882_v10, -1e+30  ;;  %v839_v21 = vsel %vm2520_vm3, %v1882_v10, 1e+30  ;;  %vm2533_vm4 = vcmp.lt.s32.totalorder %v2487_v1, %v1140_v17  ;;  %v1444_v24 = vstv %s2494_s19  ;;  %s818_s26 = scalar_select %p531_p4, 1, 0 }
  0x70   : > { %v840_v25 = vsel %vm225_vm0, %v838_v20, -inf  ;;  %v843_v26 = vsel %vm225_vm0, %v839_v21, inf  ;;  %v1142_v27 = vsel %vm2533_vm4, %v1890_v22, -1e+30  ;;  %v2544_v28 = vsel %vm2533_vm4, %v1890_v22, 1e+30 }
  0x71   : > { %vm2548_vm5 = vcmp.lt.s32.totalorder %v2487_v1, %v1444_v24  ;;  %v1144_v31 = vsel %vm225_vm0, %v1142_v27, -inf  ;;  %v1147_v32 = vsel %vm225_vm0, %v2544_v28, inf  ;;  %s1122_s16 = scalar_select %p835_p0, 1, 0 }
  0x72   : > { %230 = vmin.xlane.f32.xlu0 %v229_v18  ;;  %v2557_v33 = vsel %vm2548_vm5, %v1898_v29, -1e+30  ;;  %v2561_v34 = vsel %vm2548_vm5, %v1898_v29, 1e+30  ;;  %p1443_p8 = scmp.gt.s32.totalorder %s2494_s19, 0  ;;  %p3275_p12 = scmp.ne.s32.totalorder %s3250_s5, 0 }
  0x73   : > { %540 = vmin.xlane.f32.xlu1 %v539_v19  ;;  %v1448_v35 = vsel %vm225_vm0, %v2557_v33, -inf  ;;  %v1451_v36 = vsel %vm225_vm0, %v2561_v34, inf  ;;  %s1426_s29 = scalar_select %p1139_p13, 1, 0 }
  0x74   : > { %p2203_p6 = pnand %p2202_p10, %p3275_p12  ;;  %s2286_s11 = smov [#allocation9]  }
  0x75   : > { %s2205_s14 = sshll.u32 %s2286_s11, 4  ;;  %s2206_s14 = int_to_ptr.vmem [resolvable:$false] %s2205_s14 }
  0x76   : > { %841 = vmax.xlane.f32.xlu0 %v840_v25  ;;  %v2665_v25 = vld [vmem:[%s2465_s8] sm:$0xff]  ;;  %p2204_p1 = pneg %p2203_p6  ;;  %s2207_s4 = scalar_lea.vmem %s2206_s14, 256 }
  0x77   : > { %844 = vmin.xlane.f32.xlu1 %v843_v26  ;;  %p2208_p11 = scmp.lt.s32.totalorder %s3199_s21, %s2206_s14  ;;  %p2209_p3 = scmp.lt.s32.totalorder %s2207_s4, %s2201_s10 }
  0x79   : > { %p2210_p5 = por %p2209_p3, %p2208_p11 }
  0x7a   : > { %1145 = vmax.xlane.f32.xlu0 %v1144_v31 }
  0x7b   : > { %1148 = vmin.xlane.f32.xlu1 %v1147_v32  ;;  %p2211_p7 = pnand %p2210_p5, %p2204_p1 }
  0x7e   : > { %1449 = vmax.xlane.f32.xlu0 %v1448_v35 }
  0x7f   : > { %1452 = vmin.xlane.f32.xlu1 %v1451_v36 }
  0xfb   : > { %v228_v37 = vpop.xlane.xlu0 %227 }
  0xfc   : > { %vm232_vm6 = vcmp.eq.f32.partialorder %v223_v7, %v228_v37  ;;  %v538_v38 = vpop.xlane.xlu1 %537 }
  0xfd   : > { %vm233_vm7 = vmand %vm232_vm6, %vm2497_vm1  ;;  %vm542_vm8 = vcmp.eq.f32.partialorder %v534_v13, %v538_v38 }
  0xfe   : > { %v234_v39 = vsel %vm233_vm7, %v2487_v1, 16  ;;  %vm543_vm9 = vmand %vm542_vm8, %vm2505_vm2 }
  0xff   : > { %v544_v40 = vsel %vm543_vm9, %v2487_v1, 16  ;;  %v231_v41 = vpop.xlane.xlu0 %230  ;;  %v2574_v42 = vsel %vm225_vm0, %v234_v39, 2147483647 }
 0x100   : > { %vm250_vm10 = vcmp.eq.f32.partialorder %v224_v9, %v231_v41  ;;  %v541_v43 = vpop.xlane.xlu1 %540  ;;  %v237_v44 = vshra.s32 %v2574_v42, 16  ;;  %v2578_v45 = vsel %vm225_vm0, %v544_v40, 2147483647  ;;  %v236_v26 = vand.u32 65535, %v2574_v42 }
 0x101   : > { %vm251_vm11 = vmand %vm250_vm10, %vm2497_vm1  ;;  %vm560_vm12 = vcmp.eq.f32.partialorder %v535_v14, %v541_v43  ;;  %v547_v46 = vshra.s32 %v2578_v45, 16  ;;  %v546_v30 = vand.u32 65535, %v2578_v45 }
 0x102   : > { %v252_v47 = vsel %vm251_vm11, %v2487_v1, 16  ;;  %vm561_vm13 = vmand %vm560_vm12, %vm2505_vm2  ;;  %v2586_v48 = vcvt.s32.f32 %v237_v44 }
 0x103   : > { %v562_v49 = vsel %vm561_vm13, %v2487_v1, 16  ;;  %v842_v50 = vpop.xlane.xlu0 %841  ;;  %v2590_v51 = vsel %vm225_vm0, %v252_v47, 2147483647  ;;  %v2593_v53 = vcvt.s32.f32 %v547_v46  ;;  %v548_v35 = vcvt.s32.f32 %v546_v30 }
 0x104   : > { %vm846_vm14 = vcmp.eq.f32.partialorder %v838_v20, %v842_v50  ;;  %240 = vmin.xlane.f32.xlu0 %v2586_v48  ;;  %v845_v52 = vpop.xlane.xlu1 %844  ;;  %v255_v54 = vshra.s32 %v2590_v51, 16  ;;  %v2597_v55 = vsel %vm225_vm0, %v562_v49, 2147483647  ;;  %v254_v29 = vand.u32 65535, %v2590_v51 }
 0x105   : > { %vm847_vm15 = vmand %vm846_vm14, %vm2520_vm3  ;;  %vm864_vm1 = vcmp.eq.f32.partialorder %v839_v21, %v845_v52  ;;  %v565_v56 = vshra.s32 %v2597_v55, 16  ;;  %v564_v36 = vand.u32 65535, %v2597_v55 }
 0x106   : > { %v848_v57 = vsel %vm847_vm15, %v2487_v1, 16  ;;  %vm865_vm2 = vmand %vm864_vm1, %vm2520_vm3  ;;  %v2605_v58 = vcvt.s32.f32 %v255_v54 }
 0x107   : > { %v866_v59 = vsel %vm865_vm2, %v2487_v1, 16  ;;  %v1146_v60 = vpop.xlane.xlu0 %1145  ;;  %v2609_v61 = vsel %vm225_vm0, %v848_v57, 2147483647  ;;  %v2613_v63 = vcvt.s32.f32 %v565_v56  ;;  %v566_v42 = vcvt.s32.f32 %v564_v36 }
 0x108   : > { %vm1150_vm6 = vcmp.eq.f32.partialorder %v1142_v27, %v1146_v60  ;;  %550 = vmin.xlane.f32.xlu0 %v2593_v53  ;;  %258 = vmin.xlane.f32.xlu1 %v2605_v58  ;;  %v1149_v62 = vpop.xlane.xlu1 %1148  ;;  %v851_v2 = vshra.s32 %v2609_v61, 16  ;;  %v2617_v3 = vsel %vm225_vm0, %v866_v59, 2147483647  ;;  %v850_v37 = vand.u32 65535, %v2609_v61 }
 0x109   : > { %vm1151_vm3 = vmand %vm1150_vm6, %vm2533_vm4  ;;  %vm1168_vm7 = vcmp.eq.f32.partialorder %v2544_v28, %v1149_v62  ;;  %v869_v4 = vshra.s32 %v2617_v3, 16  ;;  %v238_v28 = vcvt.s32.f32 %v236_v26  ;;  %v868_v44 = vand.u32 65535, %v2617_v3  ;;  %v2716_v62 = vld [vmem:[%s2465_s8 + $0x8] sm:$0xff]  ;;  %v2761_v26 = vld [vmem:[%s2465_s8 + $0x40] sm:$0xff] }
 0x10a   : > { %v1152_v5 = vsel %vm1151_vm3, %v2487_v1, 16  ;;  %vm1169_vm8 = vmand %vm1168_vm7, %vm2533_vm4  ;;  %v2626_v6 = vcvt.s32.f32 %v851_v2  ;;  %v852_v43 = vcvt.s32.f32 %v850_v37  ;;  %v269_v61 = vmul.f32 %v2665_v25, %v2665_v25 }
 0x10b   : > { %v1170_v7 = vsel %vm1169_vm8, %v2487_v1, 16  ;;  %v1450_v8 = vpop.xlane.xlu0 %1449  ;;  %v2630_v9 = vsel %vm225_vm0, %v1152_v5, 2147483647  ;;  %v2635_v11 = vcvt.s32.f32 %v869_v4  ;;  %v870_v50 = vcvt.s32.f32 %v868_v44 }
 0x10c   : > { %vm1454_vm9 = vcmp.eq.f32.partialorder %v2557_v33, %v1450_v8  ;;  %568 = vmin.xlane.f32.xlu1 %v2613_v63  ;;  %854 = vmin.xlane.f32.xlu0 %v2626_v6  ;;  %v1453_v10 = vpop.xlane.xlu1 %1452  ;;  %v1155_v12 = vshra.s32 %v2630_v9, 16  ;;  %v2639_v13 = vsel %vm225_vm0, %v1170_v7, 2147483647  ;;  %v1154_v45 = vand.u32 65535, %v2630_v9  ;;  %v2731_v9 = vld [vmem:[%s2465_s8 + $0x18] sm:$0xff] }
 0x10d   : > { %vm1455_vm4 = vmand %vm1454_vm9, %vm2548_vm5  ;;  %vm1472_vm10 = vcmp.eq.f32.partialorder %v2561_v34, %v1453_v10  ;;  %v1173_v14 = vshra.s32 %v2639_v13, 16  ;;  %v256_v34 = vcvt.s32.f32 %v254_v29  ;;  %v1172_v52 = vand.u32 65535, %v2639_v13  ;;  %v2734_v10 = vld [vmem:[%s2465_s8 + $0x20] sm:$0xff] }
 0x10e   : > { %v1456_v15 = vsel %vm1455_vm4, %v2487_v1, 16  ;;  %vm1473_vm11 = vmand %vm1472_vm10, %vm2548_vm5  ;;  %v1157_v16 = vcvt.s32.f32 %v1155_v12  ;;  %vm271_vm5 = vcmask 261120   ;;  %v1156_v51 = vcvt.s32.f32 %v1154_v45 }
 0x10f   : > { %v1474_v17 = vsel %vm1473_vm11, %v2487_v1, 16  ;;  %v1457_v18 = vsel %vm225_vm0, %v1456_v15, 2147483647  ;;  %v2651_v19 = vcvt.s32.f32 %v1173_v14  ;;  %1951 = vmatprep.mubr.msk.f32.mxu1 %vm271_vm5, %v2665_v25  ;;  %v270_v7 = vmul.f32 %v2716_v62, %v2716_v62 }
 0x110   : > { %872 = vmin.xlane.f32.xlu1 %v2635_v11  ;;  %1158 = vmin.xlane.f32.xlu0 %v1157_v16  ;;  %v1459_v20 = vshra.s32 %v1457_v18, 16  ;;  %v2654_v21 = vsel %vm225_vm0, %v1474_v17, 2147483647  ;;  %v580_v14 = vmul.f32 %v2731_v9, %v2731_v9  ;;  %v883_v15 = vmul.f32 %v2734_v10, %v2734_v10  ;;  %v2746_v17 = vld [vmem:[%s2465_s8 + $0x30] sm:$0xff] }
 0x111   : > { %v1477_v22 = vshra.s32 %v2654_v21, 16  ;;  %v1476_v60 = vand.u32 65535, %v2654_v21  ;;  %v275_v12 = vsel %vm271_vm5, %v270_v7, 0.0  ;;  %vm2283_vm8 = vmmov 0  }
 0x112   : > { %v2657_v23 = vcvt.s32.f32 %v1459_v20  ;;  %v885_v20 = vsel %vm271_vm5, %v883_v15, 0.0  ;;  %vm453_vm9 = vcmp.eq.s32.totalorder %v2487_v1, 0  ;;  %vm510_vm11 = vcmask 8192  }
 0x113   : > { %v2661_v24 = vcvt.s32.f32 %v1477_v22  ;;  %v1478_v5 = vcvt.s32.f32 %v1476_v60  ;;  %v1187_v22 = vmul.f32 %v2746_v17, %v2746_v17 }
 0x114   : > { %1176 = vmin.xlane.f32.xlu1 %v2651_v19  ;;  %1462 = vmin.xlane.f32.xlu0 %v2657_v23 }
 0x115   : > { %v1189_v29 = vsel %vm271_vm5, %v1187_v22, 0.0 }
 0x118   : > { %1480 = vmin.xlane.f32.xlu1 %v2661_v24 }
 0x191   : > { %v2670_v27 = vpop.xlane.xlu0 %240 }
 0x192   : > { %vm242_vm0 = vcmp.eq.f32.partialorder %v2586_v48, %v2670_v27 }
 0x193   : > { %v243_v31 = vsel %vm242_vm0, %v238_v28, inf  ;;  %vm295_vm0 = vcmask 130048  }
 0x194   : > { %244 = vmin.xlane.f32.xlu0 %v243_v31  ;;  %v1491_v31 = vmul.f32 %v2761_v26, %v2761_v26 }
 0x195   : > { %v2676_v32 = vpop.xlane.xlu1 %258  ;;  %v2678_v33 = vpop.xlane.xlu0 %550 }
 0x196   : > { %vm260_vm12 = vcmp.eq.f32.partialorder %v2605_v58, %v2676_v32  ;;  %vm552_vm13 = vcmp.eq.f32.partialorder %v2593_v53, %v2678_v33  ;;  %v1458_v53 = vand.u32 65535, %v1457_v18  ;;  %v1174_v58 = vcvt.s32.f32 %v1172_v52 }
 0x197   : > { %v261_v38 = vsel %vm260_vm12, %v256_v34, inf  ;;  %v553_v39 = vsel %vm552_vm13, %v548_v35, inf  ;;  %v2003_v18 = vpack.c.bf16 %v2716_v62, %v2665_v25  ;;  %v2284_v25 = vmov 0.0   ;;  %v2773_v34 = vld [vmem:[%s2465_s8 + $0x48] sm:$0xff] }
 0x198   : > { %262 = vmin.xlane.f32.xlu1 %v261_v38  ;;  %554 = vmin.xlane.f32.xlu0 %v553_v39  ;;  %v1460_v59 = vcvt.s32.f32 %v1458_v53  ;;  %v1493_v36 = vsel %vm271_vm5, %v1491_v31, 0.0  ;;  %v1492_v37 = vmul.f32 %v2773_v34, %v2773_v34  ;;  %v247_v39 = vcvt.f32.s32 %v2670_v27 }
 0x199   : > { %v2686_v40 = vpop.xlane.xlu1 %568  ;;  %v2688_v41 = vpop.xlane.xlu0 %854  ;;  %1946 = vmatprep.mubr.msk.f32.mxu0 %vm2283_vm8, %v2284_v25  ;;  %v265_v44 = vcvt.f32.s32 %v2676_v32 }
 0x19a   : > { %vm570_vm14 = vcmp.eq.f32.partialorder %v2613_v63, %v2686_v40  ;;  %vm856_vm15 = vcmp.eq.f32.partialorder %v2626_v6, %v2688_v41  ;;  %v2719_v63 = vld [vmem:[%s2465_s8 + $0x10] sm:$0xff]  ;;  %v272_v6 = vsel %vm271_vm5, %v269_v61, 0.0  ;;  %v1496_v38 = vsel %vm271_vm5, %v1492_v37, 0.0 }
 0x19b   : > { %v571_v46 = vsel %vm570_vm14, %v566_v42, inf  ;;  %v857_v47 = vsel %vm856_vm15, %v852_v43, inf  ;;  %v579_v8 = vmul.f32 %v2719_v63, %v2719_v63  ;;  %v2782_v42 = vshrl.u32 %v210_v0, 7 }
 0x19c   : > { %572 = vmin.xlane.f32.xlu1 %v571_v46  ;;  %858 = vmin.xlane.f32.xlu0 %v857_v47  ;;  %v557_v46 = vcvt.f32.s32 %v2678_v33  ;;  %v248_v47 = vshll.u32 %v247_v39, 16  ;;  %v2006_v27 = vpack.c.bf16 %v2731_v9, %v2719_v63 }
 0x19d   : > { %v2696_v48 = vpop.xlane.xlu1 %872  ;;  %v2698_v49 = vpop.xlane.xlu0 %1158  ;;  %v581_v13 = vsel %vm271_vm5, %v579_v8, 0.0  ;;  %v2793_v0 = vsub.s32 0, %v2782_v42  ;;  %vm282_vm4 = vcmp.eq.s32.totalorder %v2782_v42, 0 }
 0x19e   : > { %vm874_vm1 = vcmp.eq.f32.partialorder %v2635_v11, %v2696_v48  ;;  %vm1160_vm2 = vcmp.eq.f32.partialorder %v1157_v16, %v2698_v49  ;;  %v2743_v16 = vld [vmem:[%s2465_s8 + $0x28] sm:$0xff]  ;;  %v879_v52 = vcvt.f32.s32 %v2696_v48  ;;  %v1165_v53 = vcvt.f32.s32 %v2698_v49 }
 0x19f   : > { %v875_v54 = vsel %vm874_vm1, %v870_v50, inf  ;;  %v1161_v55 = vsel %vm1160_vm2, %v1156_v51, inf  ;;  %v884_v21 = vmul.f32 %v2743_v16, %v2743_v16  ;;  %v575_v50 = vcvt.f32.s32 %v2686_v40 }
 0x1a0   : > { %876 = vmin.xlane.f32.xlu1 %v875_v54  ;;  %1162 = vmin.xlane.f32.xlu0 %v1161_v55  ;;  %v861_v51 = vcvt.f32.s32 %v2688_v41  ;;  %v266_v55 = vshll.u32 %v265_v44, 16  ;;  %v558_v60 = vshll.u32 %v557_v46, 16  ;;  %v2009_v40 = vpack.c.bf16 %v2743_v16, %v2734_v10 }
 0x1a1   : > { %v2704_v56 = vpop.xlane.xlu1 %1176  ;;  %v2706_v57 = vpop.xlane.xlu0 %1462  ;;  %v888_v28 = vsel %vm271_vm5, %v884_v21, 0.0  ;;  %v576_v48 = vshll.u32 %v575_v50, 16  ;;  %v880_v61 = vshll.u32 %v879_v52, 16 }
 0x1a2   : > { %vm1178_vm6 = vcmp.eq.f32.partialorder %v2651_v19, %v2704_v56  ;;  %vm1464_vm3 = vcmp.eq.f32.partialorder %v2657_v23, %v2706_v57  ;;  %v584_v19 = vsel %vm271_vm5, %v580_v14, 0.0  ;;  %v2282_v23 = vmov 0.0|0.0  }
 0x1a3   : > { %v1179_v2 = vsel %vm1178_vm6, %v1174_v58, inf  ;;  %v1465_v3 = vsel %vm1464_vm3, %v1460_v59, inf  ;;  %2002 = vmatprep.subr.bf16.mxu0 %v2282_v23  ;;  %v862_v49 = vshll.u32 %v861_v51, 16  ;;  %v1183_v14 = vcvt.f32.s32 %v2704_v56 }
 0x1a4   : > { %1180 = vmin.xlane.f32.xlu1 %v1179_v2  ;;  %1466 = vmin.xlane.f32.xlu0 %v1465_v3  ;;  %v1166_v3 = vshll.u32 %v1165_v53, 16 }
 0x1a5   : > { %v2721_v4 = vpop.xlane.xlu1 %1480  ;;  %2004 = vmatpush3.bf16.msra.mxu0 %v2003_v18  ;;  %v1184_v44 = vshll.u32 %v1183_v14, 16 }
 0x1a6   : > { %vm1482_vm7 = vcmp.eq.f32.partialorder %v2661_v24, %v2721_v4  ;;  %v2758_v24 = vld [vmem:[%s2465_s8 + $0x38] sm:$0xff]  ;;  %2005 = vmatprep.subr.bf16.mxu0 %v2282_v23  ;;  %v1487_v50 = vcvt.f32.s32 %v2721_v4  ;;  %s1730_s8 = scalar_select %p1443_p8, 1, 0 }
 0x1a7   : > { %v1483_v11 = vsel %vm1482_vm7, %v1478_v5, inf  ;;  %v1188_v30 = vmul.f32 %v2758_v24, %v2758_v24  ;;  %v2012_v41 = vpack.c.bf16 %v2758_v24, %v2746_v17 }
 0x1a8   : > { %1484 = vmin.xlane.f32.xlu1 %v1483_v11  ;;  %273 = vadd.xlane.f32.xlu0 %v272_v6 }
 0x1a9   : > { %v1192_v35 = vsel %vm271_vm5, %v1188_v30, 0.0 }
 0x1ac   : > { %276 = vadd.xlane.f32.xlu1 %v275_v12  ;;  %582 = vadd.xlane.f32.xlu0 %v581_v13 }
 0x1b0   : > { %585 = vadd.xlane.f32.xlu1 %v584_v19  ;;  %886 = vadd.xlane.f32.xlu0 %v885_v20  ;;  %v2285_v19 = vmov 1.0  }
 0x1b4   : > { %889 = vadd.xlane.f32.xlu1 %v888_v28  ;;  %1190 = vadd.xlane.f32.xlu0 %v1189_v29 }
 0x1b8   : > { %1193 = vadd.xlane.f32.xlu1 %v1192_v35  ;;  %1494 = vadd.xlane.f32.xlu0 %v1493_v36 }
 0x1bc   : > { %1497 = vadd.xlane.f32.xlu1 %v1496_v38  ;;  %v1469_v38 = vcvt.f32.s32 %v2706_v57 }
 0x221   : > { %v245_v43 = vpop.xlane.xlu0 %244 }
 0x222   : > { %v246_v45 = vcvt.f32.s32 %v245_v43 }
 0x224   : > { %v249_v58 = vadd.s32 %v248_v47, %v246_v45 }
 0x225   : > { %v263_v54 = vpop.xlane.xlu1 %262  ;;  %v555_v32 = vpop.xlane.xlu0 %554 }
 0x226   : > { %v264_v33 = vcvt.f32.s32 %v263_v54  ;;  %v556_v59 = vcvt.f32.s32 %v555_v32  ;;  %v286_v8 = vrot.slane %v249_v58, %v2793_v0 }
 0x228   : > { %v267_v2 = vadd.s32 %v266_v55, %v264_v33  ;;  %v559_v5 = vadd.s32 %v558_v60, %v556_v59  ;;  %v1470_v59 = vshll.u32 %v1469_v38, 16 }
 0x229   : > { %v573_v6 = vpop.xlane.xlu1 %572  ;;  %v859_v7 = vpop.xlane.xlu0 %858 }
 0x22a   : > { %v290_v11 = vrot.slane %v267_v2, %v2793_v0  ;;  %v2805_v12 = vsel %vm453_vm9, %v249_v58, %v267_v2  ;;  %v574_v13 = vcvt.f32.s32 %v573_v6  ;;  %v860_v15 = vcvt.f32.s32 %v859_v7 }
 0x22b   : > { %vm268_vm10 = vcmp.eq.s32.totalorder %v249_v58, %v267_v2  ;;  %v594_v22 = vrot.slane %v559_v5, %v2793_v0 }
 0x22c   : > { %v577_v18 = vadd.s32 %v576_v48, %v574_v13  ;;  %v507_v20 = vsel %vm268_vm10, 0.0, %v2285_v19  ;;  %v291_v21 = vsel %vm282_vm4, %v286_v8, %v290_v11  ;;  %v863_v28 = vadd.s32 %v862_v49, %v860_v15 }
 0x22d   : > { %v877_v29 = vpop.xlane.xlu1 %876  ;;  %v1163_v30 = vpop.xlane.xlu0 %1162  ;;  %v2814_v31 = vsel %vm453_vm9, 1.0, %v507_v20  ;;  %vm292_vm12 = vcmp.eq.s32.totalorder %v2487_v1, %v291_v21 }
 0x22e   : > { %v598_v56 = vrot.slane %v577_v18, %v2793_v0  ;;  %v2820_v35 = vsel %vm453_vm9, %v559_v5, %v577_v18  ;;  %v878_v36 = vcvt.f32.s32 %v877_v29  ;;  %v1164_v37 = vcvt.f32.s32 %v1163_v30 }
 0x22f   : > { %v518_v39 = vsel %vm510_vm11, %v2814_v31, 0.0  ;;  %v1867_v43 = vsel %vm292_vm12, 1.0, %v2284_v25  ;;  %vm578_vm13 = vcmp.eq.s32.totalorder %v559_v5, %v577_v18  ;;  %v898_v54 = vrot.slane %v863_v28, %v2793_v0 }
 0x230   : > { %v881_v45 = vadd.s32 %v880_v61, %v878_v36  ;;  %519 = vadd.xlane.f32.xlu0 %v518_v39  ;;  %1947 = vmatmul.mubr.msk.f32.vlgmr.msra.gmra.mrb[0].mxu0 %vm295_vm0, %v1867_v43  ;;  %v812_v46 = vsel %vm578_vm13, 0.0, %v2285_v19  ;;  %v599_v47 = vsel %vm282_vm4, %v594_v22, %v598_v56  ;;  %v1167_v51 = vadd.s32 %v1166_v3, %v1164_v37 }
 0x231   : > { %2007 = vmatpush3.bf16.msra.mxu0 %v2006_v27  ;;  %v1181_v57 = vpop.xlane.xlu1 %1180  ;;  %v1467_v52 = vpop.xlane.xlu0 %1466  ;;  %v2833_v53 = vsel %vm453_vm9, 1.0, %v812_v46  ;;  %1958 = vmatprep.mubr.msk.f32.mxu0 %vm2283_vm8, %v2284_v25  ;;  %vm600_vm14 = vcmp.eq.s32.totalorder %v2487_v1, %v599_v47  ;;  %v1488_v61 = vshll.u32 %v1487_v50, 16  ;;  %v2015_v18 = vpack.c.bf16 %v2773_v34, %v2761_v26 }
 0x232   : > { %v902_v32 = vrot.slane %v881_v45, %v2793_v0  ;;  %v2842_v4 = vsel %vm453_vm9, %v863_v28, %v881_v45  ;;  %v1182_v27 = vcvt.f32.s32 %v1181_v57  ;;  %2008 = vmatprep.subr.bf16.mxu0 %v2282_v23  ;;  %v1468_v55 = vcvt.f32.s32 %v1467_v52 }
 0x233   : > { %v822_v58 = vsel %vm510_vm11, %v2833_v53, 0.0  ;;  %v1875_v33 = vsel %vm600_vm14, 1.0, %v2284_v25  ;;  %vm882_vm15 = vcmp.eq.s32.totalorder %v863_v28, %v881_v45  ;;  %v1202_v2 = vrot.slane %v1167_v51, %v2793_v0 }
 0x234   : > { %v1185_v60 = vadd.s32 %v1184_v44, %v1182_v27  ;;  %823 = vadd.xlane.f32.xlu1 %v822_v58  ;;  %1959 = vmatmul.mubr.msk.f32.vlgmr.msra.gmra.mrb[2].mxu0 %vm295_vm0, %v1875_v33  ;;  %v1116_v48 = vsel %vm882_vm15, 0.0, %v2285_v19  ;;  %v903_v49 = vsel %vm282_vm4, %v898_v54, %v902_v32  ;;  %v1471_v8 = vadd.s32 %v1470_v59, %v1468_v55 }
 0x235   : > { %2010 = vmatpush3.bf16.msra.mxu0 %v2009_v40  ;;  %v1485_v3 = vpop.xlane.xlu1 %1484  ;;  %1970 = vmatprep.mubr.msk.f32.mxu0 %vm2283_vm8, %v2284_v25  ;;  %v2860_v5 = vsel %vm453_vm9, 1.0, %v1116_v48  ;;  %vm904_vm1 = vcmp.eq.s32.totalorder %v2487_v1, %v903_v49  ;;  %v2938_v55 = vadd.s32 8, %v2782_v42  ;;  %v2942_v58 = vrot.slane %v2805_v12, %v2793_v0 }
 0x236   : > { %v1206_v6 = vrot.slane %v1185_v60, %v2793_v0  ;;  %v2866_v7 = vsel %vm453_vm9, %v1167_v51, %v1185_v60  ;;  %v1486_v11 = vcvt.f32.s32 %v1485_v3  ;;  %2011 = vmatprep.subr.bf16.mxu0 %v2282_v23  ;;  %v1126_v40 = vsel %vm510_vm11, %v2860_v5, 0.0 }
 0x237   : > { %v1883_v13 = vsel %vm904_vm1, 1.0, %v2284_v25  ;;  %1127 = vadd.xlane.f32.xlu0 %v1126_v40  ;;  %v1506_v20 = vrot.slane %v1471_v8, %v2793_v0  ;;  %vm1186_vm6 = vcmp.eq.s32.totalorder %v1167_v51, %v1185_v60  ;;  %v2948_v60 = vrot.slane %v2820_v35, %v2793_v0 }
 0x238   : > { %v1489_v14 = vadd.s32 %v1488_v61, %v1486_v11  ;;  %1971 = vmatmul.mubr.msk.f32.vlgmr.msra.gmra.mrb[4].mxu0 %vm295_vm0, %v1883_v13  ;;  %v1207_v15 = vsel %vm282_vm4, %v1202_v2, %v1206_v6  ;;  %v1420_v30 = vsel %vm1186_vm6, 0.0, %v2285_v19  ;;  %v2954_v61 = vrot.slane %v2842_v4, %v2793_v0 }
 0x239   : > { %2013 = vmatpush3.bf16.msra.mxu0 %v2012_v41  ;;  %1982 = vmatprep.mubr.msk.f32.mxu0 %vm2283_vm8, %v2284_v25  ;;  %vm1208_vm2 = vcmp.eq.s32.totalorder %v2487_v1, %v1207_v15  ;;  %vm766_vm10 = vcmp.eq.s32.totalorder %v2938_v55, %v2948_v60  ;;  %vm765_vm12 = vcmp.eq.s32.totalorder %v2782_v42, %v2948_v60 }
 0x23a   : > { %v1510_v21 = vrot.slane %v1489_v14, %v2793_v0  ;;  %v2887_v22 = vsel %vm453_vm9, %v1471_v8, %v1489_v14  ;;  %2014 = vmatprep.subr.bf16.mxu0 %v2282_v23  ;;  %v1891_v28 = vsel %vm1208_vm2, 1.0, %v2284_v25  ;;  %vm1490_vm3 = vcmp.eq.s32.totalorder %v1471_v8, %v1489_v14 }
 0x23b   : > { %v2901_v23 = vsel %vm453_vm9, 1.0, %v1420_v30  ;;  %v1724_v56 = vsel %vm1490_vm3, 0.0, %v2285_v19  ;;  %v2993_v14 = vrot.slane %v2866_v7, %v2793_v0  ;;  %vm1069_vm13 = vcmp.eq.s32.totalorder %v2782_v42, %v2954_v61 }
 0x23c   : > { %1983 = vmatmul.mubr.msk.f32.vlgmr.msra.gmra.mrb[6].mxu0 %vm295_vm0, %v1891_v28  ;;  %v1511_v41 = vsel %vm282_vm4, %v1506_v20, %v1510_v21  ;;  %v2907_v36 = vsel %vm453_vm9, 1.0, %v1724_v56  ;;  %vm463_vm9 = vcmask 15360  }
 0x23d   : > { %2016 = vmatpush3.bf16.msra.mxu0 %v2015_v18  ;;  %1994 = vmatprep.mubr.msk.f32.mxu0 %vm2283_vm8, %v2284_v25  ;;  %vm1512_vm7 = vcmp.eq.s32.totalorder %v2487_v1, %v1511_v41  ;;  %vm459_vm8 = vcmp.eq.s32.totalorder %v2782_v42, %v2942_v58  ;;  %vm1374_vm14 = vcmp.eq.s32.totalorder %v2938_v55, %v2993_v14 }
 0x23e   : > { %v1899_v29 = vsel %vm1512_vm7, 1.0, %v2284_v25  ;;  %vm1373_vm15 = vcmp.eq.s32.totalorder %v2782_v42, %v2993_v14 }
 0x240   : > { %1995 = vmatmul.mubr.msk.f32.vlgmr.msra.gmra.mrb[8].mxu0 %vm295_vm0, %v1899_v29  ;;  %vm1070_vm0 = vcmp.eq.s32.totalorder %v2938_v55, %v2954_v61 }
 0x303   : > { %v365_v37 = vpop.f32.mrb[0].mxu0 }
 0x304   : > { %v1948_v38 = vpop.f32.mrb[1].mxu0  ;;  %1949 = vmatprep.subr.msk.mxu1 %vm271_vm5, %v365_v37 }
 0x305   : > { %1950 = vmatpush3.xpose.msk.msra.mxu1 %vm271_vm5, %v365_v37 }
 0x307   : > { %v672_v25 = vpop.f32.mrb[2].mxu0 }
 0x308   : > { %1952 = vmatmul.mubr.msk.f32.vlgmr.msra.gmra.mrb[0].mxu1 %vm271_vm5, %v2716_v62  ;;  %v1960_v39 = vpop.f32.mrb[3].mxu0  ;;  %1961 = vmatprep.subr.msk.mxu1 %vm271_vm5, %v672_v25 }
 0x309   : > { %1962 = vmatpush3.xpose.msk.msra.mxu1 %vm271_vm5, %v672_v25  ;;  %1963 = vmatprep.mubr.msk.f32.mxu1 %vm271_vm5, %v2719_v63 }
 0x30b   : > { %v976_v1 = vpop.f32.mrb[4].mxu0 }
 0x30c   : > { %1964 = vmatmul.mubr.msk.f32.vlgmr.msra.gmra.mrb[2].mxu1 %vm271_vm5, %v2731_v9  ;;  %v1972_v19 = vpop.f32.mrb[5].mxu0  ;;  %1973 = vmatprep.subr.msk.mxu1 %vm271_vm5, %v976_v1 }
 0x30d   : > { %1974 = vmatpush3.xpose.msk.msra.mxu1 %vm271_vm5, %v976_v1  ;;  %1975 = vmatprep.mubr.msk.f32.mxu1 %vm271_vm5, %v2734_v10  ;;  %v277_v10 = vpop.xlane.xlu1 %276  ;;  %v3028_v19 = vrot.slane %v2887_v22, %v2793_v0 }
 0x30e   : > { %v279_v46 = vmax.f32 %v277_v10, 1e-24 }
 0x30f   : > { %v1280_v62 = vpop.f32.mrb[6].mxu0  ;;  %vm1678_vm1 = vcmp.eq.s32.totalorder %v2938_v55, %v3028_v19  ;;  %vm1677_vm2 = vcmp.eq.s32.totalorder %v2782_v42, %v3028_v19 }
 0x310   : > { %1976 = vmatmul.mubr.msk.f32.vlgmr.msra.gmra.mrb[4].mxu1 %vm271_vm5, %v2743_v16  ;;  %v1984_v43 = vpop.f32.mrb[7].mxu0  ;;  %1985 = vmatprep.subr.msk.mxu1 %vm271_vm5, %v1280_v62  ;;  %v274_v16 = vpop.xlane.xlu0 %273  ;;  %2081 = vrsqrt.f32 %v279_v46 }
 0x311   : > { %1986 = vmatpush3.xpose.msk.msra.mxu1 %vm271_vm5, %v1280_v62  ;;  %1987 = vmatprep.mubr.msk.f32.mxu1 %vm271_vm5, %v2746_v17  ;;  %v586_v44 = vpop.xlane.xlu1 %585  ;;  %v278_v47 = vmax.f32 %v274_v16, 1e-24 }
 0x313   : > { %v1584_v63 = vpop.f32.mrb[8].mxu0  ;;  %2083 = vrsqrt.f32 %v278_v47 }
 0x314   : > { %1988 = vmatmul.mubr.msk.f32.vlgmr.msra.gmra.mrb[6].mxu1 %vm271_vm5, %v2758_v24  ;;  %v1996_v9 = vpop.f32.mrb[9].mxu0  ;;  %1997 = vmatprep.subr.msk.mxu1 %vm271_vm5, %v1584_v63  ;;  %v583_v45 = vpop.xlane.xlu0 %582  ;;  %v588_v24 = vmax.f32 %v586_v44, 1e-24 }
 0x315   : > { %1998 = vmatpush3.xpose.msk.msra.mxu1 %vm271_vm5, %v1584_v63  ;;  %1999 = vmatprep.mubr.msk.f32.mxu1 %vm271_vm5, %v2761_v26  ;;  %v890_v17 = vpop.xlane.xlu1 %889  ;;  %v587_v57 = vmax.f32 %v583_v45, 1e-24 }
 0x316   : > { %v892_v51 = vmax.f32 %v890_v17, 1e-24  ;;  %2085 = vrsqrt.f32 %v588_v24 }
 0x318   : > { %2000 = vmatmul.mubr.msk.f32.vlgmr.msra.gmra.mrb[8].mxu1 %vm271_vm5, %v2773_v34  ;;  %v887_v50 = vpop.xlane.xlu0 %886  ;;  %2087 = vrsqrt.f32 %v892_v51  ;;  %vm460_vm5 = vcmp.eq.s32.totalorder %v2938_v55, %v2942_v58 }
 0x319   : > { %v891_v52 = vmax.f32 %v887_v50, 1e-24  ;;  %v1194_v54 = vpop.xlane.xlu1 %1193  ;;  %2089 = vrsqrt.f32 %v587_v57 }
 0x31a   : > { %v1196_v34 = vmax.f32 %v1194_v54, 1e-24  ;;  %v2944_v33 = vpop.eup %2081 }
 0x31b   : > { %2091 = vrsqrt.f32 %v891_v52  ;;  %v462_v35 = vsel %vm460_vm5, %v2944_v33, 0.0 }
 0x31c   : > { %v1191_v26 = vpop.xlane.xlu0 %1190  ;;  %2093 = vrsqrt.f32 %v1196_v34  ;;  %v465_v40 = vsel %vm463_vm9, %v462_v35, 0.0 }
 0x31d   : > { %v1195_v32 = vmax.f32 %v1191_v26, 1e-24  ;;  %v1498_v27 = vpop.xlane.xlu1 %1497  ;;  %v2950_v48 = vpop.eup %2083 }
 0x31e   : > { %v1500_v49 = vmax.f32 %v1498_v27, 1e-24  ;;  %v461_v8 = vsel %vm459_vm8, %v2950_v48, 0.0 }
 0x31f   : > { %2095 = vrsqrt.f32 %v1195_v32  ;;  %v464_v20 = vsel %vm463_vm9, %v461_v8, 0.0  ;;  %v474_v8 = vmul.f32 10.0, %v2944_v33 }
 0x320   : > { %v1495_v59 = vpop.xlane.xlu0 %1494  ;;  %v2956_v2 = vpop.eup %2085  ;;  %2097 = vrsqrt.f32 %v1500_v49  ;;  %v466_v28 = vadd.f32 %v465_v40, %v464_v20 }
 0x321   : > { %v1499_v3 = vmax.f32 %v1495_v59, 1e-24  ;;  %v768_v11 = vsel %vm766_vm10, %v2956_v2, 0.0 }
 0x322   : > { %v2960_v12 = vpop.eup %2087  ;;  %v770_v21 = vsel %vm463_vm9, %v768_v11, 0.0  ;;  %v467_v39 = vrot.slane %v466_v28, 4 }
 0x323   : > { %v2966_v6 = vpop.eup %2089  ;;  %v1072_v13 = vsel %vm1070_vm0, %v2960_v12, 0.0  ;;  %2099 = vrsqrt.f32 %v1499_v3 }
 0x324   : > { %v767_v15 = vsel %vm765_vm12, %v2966_v6, 0.0  ;;  %v1074_v41 = vsel %vm463_vm9, %v1072_v13, 0.0  ;;  %v468_v44 = vadd.f32 %v467_v39, %v466_v28  ;;  %v473_v13 = vmul.f32 10.0, %v2950_v48 }
 0x325   : > { %v2972_v4 = vpop.eup %2091  ;;  %v769_v30 = vsel %vm463_vm9, %v767_v15, 0.0 }
 0x326   : > { %v3001_v18 = vpop.eup %2093  ;;  %v1071_v7 = vsel %vm1069_vm13, %v2972_v4, 0.0  ;;  %v771_v56 = vadd.f32 %v770_v21, %v769_v30  ;;  %v469_v50 = vrot.slane %v468_v44, 2 }
 0x327   : > { %v1073_v37 = vsel %vm463_vm9, %v1071_v7, 0.0  ;;  %v1376_v38 = vsel %vm1374_vm14, %v3001_v18, 0.0 }
 0x328   : > { %v1075_v25 = vadd.f32 %v1074_v41, %v1073_v37  ;;  %v1378_v62 = vsel %vm463_vm9, %v1376_v38, 0.0  ;;  %v772_v63 = vrot.slane %v771_v56, 4  ;;  %v470_v34 = vadd.f32 %v469_v50, %v468_v44 }
 0x329   : > { %v3010_v29 = vpop.eup %2095  ;;  %v779_v38 = vmul.f32 10.0, %v2956_v2 }
 0x32a   : > { %v1375_v1 = vsel %vm1373_vm15, %v3010_v29, 0.0  ;;  %v3031_v43 = vpop.eup %2097  ;;  %v1076_v9 = vrot.slane %v1075_v25, 4  ;;  %v773_v17 = vadd.f32 %v772_v63, %v771_v56  ;;  %v471_v3 = vrot.slane %v470_v34, 1 }
 0x32b   : > { %v1377_v10 = vsel %vm463_vm9, %v1375_v1, 0.0  ;;  %v1680_v22 = vsel %vm1678_vm1, %v3031_v43, 0.0  ;;  %v778_v1 = vmul.f32 10.0, %v2966_v6 }
 0x32c   : > { %v1379_v45 = vadd.f32 %v1378_v62, %v1377_v10  ;;  %v1077_v46 = vadd.f32 %v1076_v9, %v1075_v25  ;;  %v1682_v51 = vsel %vm463_vm9, %v1680_v22, 0.0  ;;  %v774_v57 = vrot.slane %v773_v17, 2 }
 0x32d   : > { %v3034_v16 = vpop.eup %2099  ;;  %v472_v21 = vadd.f32 %v471_v3, %v470_v34  ;;  %v1082_v34 = vmul.f32 10.0, %v2972_v4  ;;  %v1386_v4 = vmul.f32 10.0, %v3010_v29 }
 0x32e   : > { %v1679_v47 = vsel %vm1677_vm2, %v3034_v16, 0.0  ;;  %v1380_v24 = vrot.slane %v1379_v45, 4  ;;  %v1078_v54 = vrot.slane %v1077_v46, 2  ;;  %v775_v27 = vadd.f32 %v774_v57, %v773_v17 }
 0x32f   : > { %v1681_v52 = vsel %vm463_vm9, %v1679_v47, 0.0  ;;  %v1083_v47 = vmul.f32 10.0, %v2960_v12 }
 0x330   : > { %v1683_v26 = vadd.f32 %v1682_v51, %v1681_v52  ;;  %v1381_v32 = vadd.f32 %v1380_v24, %v1379_v45  ;;  %v1079_v59 = vadd.f32 %v1078_v54, %v1077_v46  ;;  %v776_v11 = vrot.slane %v775_v27, 1 }
 0x332   : > { %v1684_v49 = vrot.slane %v1683_v26, 4  ;;  %v1382_v35 = vrot.slane %v1381_v32, 2  ;;  %v1080_v15 = vrot.slane %v1079_v59, 1  ;;  %v777_v37 = vadd.f32 %v776_v11, %v775_v27 }
 0x334   : > { %v1685_v20 = vadd.f32 %v1684_v49, %v1683_v26  ;;  %v1383_v41 = vadd.f32 %v1382_v35, %v1381_v32  ;;  %v1081_v33 = vadd.f32 %v1080_v15, %v1079_v59  ;;  %v1387_v59 = vmul.f32 10.0, %v3001_v18 }
 0x336   : > { %v1686_v62 = vrot.slane %v1685_v20, 2  ;;  %v1384_v44 = vrot.slane %v1383_v41, 1 }
 0x338   : > { %v1687_v57 = vadd.f32 %v1686_v62, %v1685_v20 }
 0x3db   : > { %v1953_v40 = vpop.f32.mrb[0].mxu1 }
 0x3dc   : > { %v476_v7 = vmul.f32 %v1953_v40, %v474_v8  ;;  %v444_v28 = vpop.f32.mrb[1].mxu1  ;;  %v1385_v40 = vadd.f32 %v1384_v44, %v1383_v41 }
 0x3dd   : > { %v475_v30 = vmul.f32 %v473_v13, %v444_v28  ;;  %v1688_v28 = vrot.slane %v1687_v57, 1 }
 0x3de   : > { %v478_v56 = vmul.f32 %v476_v7, %v472_v21 }
 0x3df   : > { %v477_v25 = vmul.f32 %v475_v30, %v472_v21  ;;  %v1965_v39 = vpop.f32.mrb[2].mxu1 }
 0x3e0   : > { %v480_v48 = vsel %vm460_vm5, %v478_v56, 0.0  ;;  %v492_v63 = vmul.f32 1.442695, %v478_v56  ;;  %v781_v9 = vmul.f32 %v1965_v39, %v779_v38  ;;  %v751_v10 = vpop.f32.mrb[3].mxu1  ;;  %v1690_v39 = vmul.f32 10.0, %v3034_v16 }
 0x3e1   : > { %v482_v45 = vsel %vm463_vm9, %v480_v48, 0.0  ;;  %v479_v2 = vsel %vm459_vm8, %v477_v25, 0.0  ;;  %v490_v22 = vmul.f32 1.442695, %v477_v25  ;;  %v780_v17 = vmul.f32 %v778_v1, %v751_v10 }
 0x3e2   : > { %2101 = vpow2.f32 %v492_v63  ;;  %v481_v6 = vsel %vm463_vm9, %v479_v2, 0.0  ;;  %v783_v46 = vmul.f32 %v781_v9, %v777_v37  ;;  %v1691_v25 = vmul.f32 10.0, %v3031_v43 }
 0x3e3   : > { %v3063_v50 = vadd.f32 %v482_v45, %v481_v6  ;;  %2103 = vpow2.f32 %v490_v22  ;;  %v782_v24 = vmul.f32 %v780_v17, %v777_v37  ;;  %v1977_v51 = vpop.f32.mrb[4].mxu1  ;;  %v1689_v2 = vadd.f32 %v1688_v28, %v1687_v57 }
 0x3e4   : > { %v785_v52 = vsel %vm766_vm10, %v783_v46, 0.0  ;;  %v797_v58 = vmul.f32 1.442695, %v783_v46  ;;  %v1085_v54 = vmul.f32 %v1977_v51, %v1083_v47  ;;  %v1055_v26 = vpop.f32.mrb[5].mxu1  ;;  %vm1744_vm8 = vcmp.eq.s32.totalorder %v2782_v42, 1 }
 0x3e5   : > { %v787_v32 = vsel %vm463_vm9, %v785_v52, 0.0  ;;  %v784_v12 = vsel %vm765_vm12, %v782_v24, 0.0  ;;  %v795_v27 = vmul.f32 1.442695, %v782_v24  ;;  %v1084_v35 = vmul.f32 %v1082_v34, %v1055_v26 }
 0x3e6   : > { %2105 = vpow2.f32 %v797_v58  ;;  %v786_v49 = vsel %vm463_vm9, %v784_v12, 0.0  ;;  %v1087_v3 = vmul.f32 %v1085_v54, %v1081_v33 }
 0x3e7   : > { %v3075_v8 = vadd.f32 %v787_v32, %v786_v49  ;;  %2107 = vpow2.f32 %v795_v27  ;;  %v1989_v11 = vpop.f32.mrb[6].mxu1  ;;  %v1086_v15 = vmul.f32 %v1084_v35, %v1081_v33 }
 0x3e8   : > { %v1089_v60 = vsel %vm1070_vm0, %v1087_v3, 0.0  ;;  %v1101_v13 = vmul.f32 1.442695, %v1087_v3  ;;  %v1389_v20 = vmul.f32 %v1989_v11, %v1387_v59  ;;  %v1359_v18 = vpop.f32.mrb[7].mxu1 }
 0x3e9   : > { %v1091_v21 = vsel %vm463_vm9, %v1089_v60, 0.0  ;;  %v1388_v7 = vmul.f32 %v1386_v4, %v1359_v18  ;;  %v1088_v30 = vsel %vm1069_vm13, %v1086_v15, 0.0  ;;  %v1099_v41 = vmul.f32 1.442695, %v1086_v15 }
 0x3ea   : > { %2109 = vpow2.f32 %v1101_v13  ;;  %v1391_v56 = vmul.f32 %v1389_v20, %v1385_v40  ;;  %v1090_v29 = vsel %vm463_vm9, %v1088_v30, 0.0  ;;  %v484_v4 = vrot.slane %v3063_v50, 4 }
 0x3eb   : > { %v1390_v37 = vmul.f32 %v1388_v7, %v1385_v40  ;;  %v2001_v38 = vpop.f32.mrb[8].mxu1  ;;  %v3088_v33 = vadd.f32 %v1091_v21, %v1090_v29  ;;  %2111 = vpow2.f32 %v1099_v41 }
 0x3ec   : > { %v2102_v1 = vpop.eup %2101  ;;  %v1393_v62 = vsel %vm1374_vm14, %v1391_v56, 0.0  ;;  %v1405_v61 = vmul.f32 1.442695, %v1391_v56  ;;  %v1663_v48 = vpop.f32.mrb[9].mxu1  ;;  %v1693_v17 = vmul.f32 %v2001_v38, %v1691_v25  ;;  %v485_v41 = vadd.f32 %v484_v4, %v3063_v50 }
 0x3ed   : > { %v2104_v63 = vpop.eup %2103  ;;  %v495_v9 = vsel %vm463_vm9, %v2102_v1, 0.0  ;;  %v1395_v10 = vsel %vm463_vm9, %v1393_v62, 0.0  ;;  %v1392_v43 = vsel %vm1373_vm15, %v1390_v37, 0.0  ;;  %v1403_v16 = vmul.f32 1.442695, %v1390_v37 }
 0x3ee   : > { %v494_v44 = vsel %vm463_vm9, %v2104_v63, 0.0  ;;  %2113 = vpow2.f32 %v1405_v61  ;;  %v1394_v45 = vsel %vm463_vm9, %v1392_v43, 0.0  ;;  %v1692_v6 = vmul.f32 %v1690_v39, %v1663_v48 }
 0x3ef   : > { %v3100_v22 = vadd.f32 %v1395_v10, %v1394_v45  ;;  %2115 = vpow2.f32 %v1403_v16  ;;  %v496_v47 = vadd.f32 %v495_v9, %v494_v44  ;;  %v1695_v51 = vmul.f32 %v1693_v17, %v1689_v2 }
 0x3f0   : > { %v2106_v46 = vpop.eup %2105  ;;  %v1694_v52 = vmul.f32 %v1692_v6, %v1689_v2  ;;  %v789_v25 = vrot.slane %v3075_v8, 4  ;;  %v486_v63 = vrot.slane %v485_v41, 2  ;;  %v1093_v16 = vrot.slane %v3088_v33, 4 }
 0x3f1   : > { %v2108_v24 = vpop.eup %2107  ;;  %v800_v14 = vsel %vm463_vm9, %v2106_v46, 0.0  ;;  %v497_v58 = vrot.slane %v496_v47, 4  ;;  %v1697_v26 = vsel %vm1678_vm1, %v1695_v51, 0.0  ;;  %v1709_v57 = vmul.f32 1.442695, %v1695_v51 }
 0x3f2   : > { %v799_v54 = vsel %vm463_vm9, %v2108_v24, 0.0  ;;  %v1696_v34 = vsel %vm1677_vm2, %v1694_v52, 0.0  ;;  %v1699_v12 = vsel %vm463_vm9, %v1697_v26, 0.0  ;;  %v1707_v59 = vmul.f32 1.442695, %v1694_v52 }
 0x3f3   : > { %v1698_v27 = vsel %vm463_vm9, %v1696_v34, 0.0  ;;  %v498_v49 = vadd.f32 %v497_v58, %v496_v47  ;;  %2117 = vpow2.f32 %v1709_v57  ;;  %v801_v40 = vadd.f32 %v800_v14, %v799_v54 }
 0x3f4   : > { %v2110_v32 = vpop.eup %2109  ;;  %v3113_v35 = vadd.f32 %v1699_v12, %v1698_v27  ;;  %2119 = vpow2.f32 %v1707_v59  ;;  %v790_v45 = vadd.f32 %v789_v25, %v3075_v8  ;;  %v1397_v46 = vrot.slane %v3100_v22, 4 }
 0x3f5   : > { %v1104_v3 = vsel %vm463_vm9, %v2110_v32, 0.0  ;;  %v2112_v11 = vpop.eup %2111  ;;  %v499_v55 = vrot.slane %v498_v49, 2  ;;  %v802_v15 = vrot.slane %v801_v40, 4  ;;  %v487_v51 = vadd.f32 %v486_v63, %v485_v41 }
 0x3f6   : > { %v1103_v19 = vsel %vm463_vm9, %v2112_v11, 0.0  ;;  %v1094_v58 = vadd.f32 %v1093_v16, %v3088_v33  ;;  %v791_v57 = vrot.slane %v790_v45, 2  ;;  %v1398_v8 = vadd.f32 %v1397_v46, %v3100_v22 }
 0x3f7   : > { %v500_v13 = vadd.f32 %v499_v55, %v498_v49  ;;  %v1105_v20 = vadd.f32 %v1104_v3, %v1103_v19  ;;  %v803_v30 = vadd.f32 %v802_v15, %v801_v40  ;;  %v488_v27 = vrot.slane %v487_v51, 1 }
 0x3f8   : > { %v2114_v60 = vpop.eup %2113  ;;  %v1095_v3 = vrot.slane %v1094_v58, 2  ;;  %v1701_v55 = vrot.slane %v3113_v35, 4  ;;  %v792_v40 = vadd.f32 %v791_v57, %v790_v45  ;;  %v1399_v19 = vrot.slane %v1398_v8, 2 }
 0x3f9   : > { %v2116_v18 = vpop.eup %2115  ;;  %v1408_v21 = vsel %vm463_vm9, %v2114_v60, 0.0  ;;  %v501_v28 = vrot.slane %v500_v13, 1  ;;  %v1106_v56 = vrot.slane %v1105_v20, 4  ;;  %v804_v38 = vrot.slane %v803_v30, 2 }
 0x3fa   : > { %v1407_v7 = vsel %vm463_vm9, %v2116_v18, 0.0  ;;  %v1702_v18 = vadd.f32 %v1701_v55, %v3113_v35  ;;  %v819_v57 = vstv %s818_s26 }
 0x3fb   : > { %v1409_v29 = vadd.f32 %v1408_v21, %v1407_v7  ;;  %v502_v37 = vadd.f32 %v501_v28, %v500_v13  ;;  %v1107_v39 = vadd.f32 %v1106_v56, %v1105_v20  ;;  %v805_v61 = vadd.f32 %v804_v38, %v803_v30 }
 0x3fc   : > { %v489_v13 = vadd.f32 %v488_v27, %v487_v51  ;;  %v1096_v20 = vadd.f32 %v1095_v3, %v1094_v58  ;;  %v793_v7 = vrot.slane %v792_v40, 1  ;;  %v1400_v28 = vadd.f32 %v1399_v19, %v1398_v8  ;;  %v824_v8 = vpop.xlane.xlu1 %823 }
 0x3fd   : > { %v1410_v1 = vrot.slane %v1409_v29, 4  ;;  %v503_v62 = vadd.f32 1e-08, %v502_v37  ;;  %v2118_v48 = vpop.eup %2117  ;;  %v1108_v9 = vrot.slane %v1107_v39, 2  ;;  %v806_v50 = vrot.slane %v805_v61, 1 }
 0x3fe   : > { %v2120_v43 = vpop.eup %2119  ;;  %v1712_v44 = vsel %vm463_vm9, %v2118_v48, 0.0  ;;  %v794_v25 = vadd.f32 %v793_v7, %v792_v40  ;;  %vm3149_vm6 = vcmp.eq.s32.totalorder %v819_v57, 1  ;;  %v1427_v27 = vstv %s1426_s29 }
 0x3ff   : > { %v1411_v10 = vadd.f32 %v1410_v1, %v1409_v29  ;;  %2121 = vlog2.f32 %v503_v62  ;;  %v1711_v2 = vsel %vm463_vm9, %v2120_v43, 0.0  ;;  %v1109_v17 = vadd.f32 %v1108_v9, %v1107_v39 }
 0x400   : > { %v807_v47 = vadd.f32 %v806_v50, %v805_v61  ;;  %v1713_v24 = vadd.f32 %v1712_v44, %v1711_v2  ;;  %v1097_v29 = vrot.slane %v1096_v20, 1  ;;  %v1703_v1 = vrot.slane %v1702_v18, 2 }
 0x401   : > { %v1412_v6 = vrot.slane %v1411_v10, 2  ;;  %v1110_v52 = vrot.slane %v1109_v17, 1  ;;  %v1401_v62 = vrot.slane %v1400_v28, 1  ;;  %v1731_v40 = vstv %s1730_s8 }
 0x402   : > { %v808_v54 = vadd.f32 1e-08, %v807_v47  ;;  %v1714_v26 = vrot.slane %v1713_v24, 4  ;;  %v1098_v35 = vadd.f32 %v1097_v29, %v1096_v20  ;;  %v1704_v43 = vadd.f32 %v1703_v1, %v1702_v18 }
 0x403   : > { %v1413_v14 = vadd.f32 %v1412_v6, %v1411_v10  ;;  %v1111_v34 = vadd.f32 %v1110_v52, %v1109_v17  ;;  %v1430_v10 = vsel %vm510_vm11, %v2901_v23, 0.0  ;;  %v1402_v44 = vadd.f32 %v1401_v62, %v1400_v28 }
 0x404   : > { %2123 = vlog2.f32 %v808_v54  ;;  %v1715_v12 = vadd.f32 %v1714_v26, %v1713_v24  ;;  %v1734_v6 = vsel %vm510_vm11, %v2907_v36, 0.0  ;;  %v1705_v46 = vrot.slane %v1704_v43, 1  ;;  %v520_v26 = vpop.xlane.xlu0 %519 }
 0x405   : > { %v1414_v32 = vrot.slane %v1413_v14, 1  ;;  %v1112_v59 = vadd.f32 1e-08, %v1111_v34  ;;  %vm3163_vm7 = vcmp.eq.s32.totalorder %v1427_v27, 1  ;;  %vm3171_vm5 = vcmp.eq.s32.totalorder %v1731_v40, 1 }
 0x406   : > { %v1716_v11 = vrot.slane %v1715_v12, 2  ;;  %v1706_v52 = vadd.f32 %v1705_v46, %v1704_v43 }
 0x407   : > { %v1415_v49 = vadd.f32 %v1414_v32, %v1413_v14  ;;  %2125 = vlog2.f32 %v1112_v59  ;;  %v515_v32 = vstv %s514_s20 }
 0x408   : > { %v1717_v60 = vadd.f32 %v1716_v11, %v1715_v12  ;;  %v1123_v12 = vstv %s1122_s16  ;;  %v825_v11 = vsel %vm3149_vm6, %v824_v8, 0.0 }
 0x409   : > { %v1416_v4 = vadd.f32 1e-08, %v1415_v49  ;;  %v2122_v33 = vpop.eup %2121  ;;  %vm3157_vm3 = vcmp.eq.s32.totalorder %v1123_v12, 1 }
 0x40a   : > { %v505_v15 = vmul.f32 0.6931472, %v2122_v33  ;;  %v1718_v22 = vrot.slane %v1717_v60, 1 }
 0x40b   : > { %2127 = vlog2.f32 %v1416_v4 }
 0x40c   : > { %v506_v21 = vsub.f32 %v489_v13, %v505_v15  ;;  %v1719_v30 = vadd.f32 %v1718_v22, %v1717_v60 }
 0x40e   : > { %v509_v41 = vmul.f32 %v2814_v31, %v506_v21  ;;  %v2124_v56 = vpop.eup %2123  ;;  %v1720_v37 = vadd.f32 1e-08, %v1719_v30 }
 0x40f   : > { %v810_v39 = vmul.f32 0.6931472, %v2124_v56 }
 0x410   : > { %v511_v38 = vsel %vm510_vm11, %v509_v41, 0.0  ;;  %2129 = vlog2.f32 %v1720_v37 }
 0x411   : > { %512 = vadd.xlane.f32.xlu0 %v511_v38  ;;  %v2126_v61 = vpop.eup %2125  ;;  %v811_v48 = vsub.f32 %v794_v25, %v810_v39 }
 0x412   : > { %v1114_v63 = vmul.f32 0.6931472, %v2126_v61 }
 0x413   : > { %v814_v31 = vmul.f32 %v2833_v53, %v811_v48 }
 0x414   : > { %v1115_v16 = vsub.f32 %v1098_v35, %v1114_v63 }
 0x415   : > { %v2128_v9 = vpop.eup %2127  ;;  %1431 = vadd.xlane.f32.xlu0 %v1430_v10  ;;  %v815_v45 = vsel %vm510_vm11, %v814_v31, 0.0 }
 0x416   : > { %v1418_v50 = vmul.f32 0.6931472, %v2128_v9  ;;  %816 = vadd.xlane.f32.xlu1 %v815_v45  ;;  %v1118_v2 = vmul.f32 %v2860_v5, %v1115_v16 }
 0x418   : > { %v1419_v17 = vsub.f32 %v1402_v44, %v1418_v50  ;;  %v1119_v53 = vsel %vm510_vm11, %v1118_v2, 0.0 }
 0x419   : > { %1735 = vadd.xlane.f32.xlu0 %v1734_v6 }
 0x41a   : > { %v1422_v47 = vmul.f32 %v2901_v23, %v1419_v17  ;;  %v2130_v24 = vpop.eup %2129  ;;  %1120 = vadd.xlane.f32.xlu1 %v1119_v53  ;;  %v1128_v23 = vpop.xlane.xlu0 %1127 }
 0x41b   : > { %v1722_v5 = vmul.f32 0.6931472, %v2130_v24  ;;  %v1129_v19 = vsel %vm3157_vm3, %v1128_v23, 0.0 }
 0x41c   : > { %v1423_v51 = vsel %vm510_vm11, %v1422_v47, 0.0 }
 0x41d   : > { %v1723_v14 = vsub.f32 %v1706_v52, %v1722_v5 }
 0x41e   : > { %1424 = vadd.xlane.f32.xlu1 %v1423_v51 }
 0x41f   : > { %v1726_v58 = vmul.f32 %v2907_v36, %v1723_v14 }
 0x421   : > { %v1727_v54 = vsel %vm510_vm11, %v1726_v58, 0.0  ;;  %vm3153_vm11 = vcmp.eq.s32.totalorder %v515_v32, 1 }
 0x422   : > { %1728 = vadd.xlane.f32.xlu1 %v1727_v54  ;;  %v521_v33 = vsel %vm3153_vm11, %v520_v26, 0.0 }
 0x423   : > { %v827_v60 = vadd.f32 %v825_v11, %v521_v33 }
 0x425   : > { %v1131_v18 = vadd.f32 %v1129_v19, %v827_v60 }
 0x49e   : > { %v513_v34 = vpop.xlane.xlu0 %512 }
 0x49f   : > { %v517_v28 = vsel %vm3153_vm11, %v513_v34, 0.0 }
 0x4a2   : > { %v1432_v59 = vpop.xlane.xlu0 %1431 }
 0x4a3   : > { %v817_v55 = vpop.xlane.xlu1 %816  ;;  %v1433_v20 = vsel %vm3163_vm7, %v1432_v59, 0.0 }
 0x4a4   : > { %v821_v21 = vsel %vm3149_vm6, %v817_v55, 0.0  ;;  %v1435_v30 = vadd.f32 %v1433_v20, %v1131_v18 }
 0x4a5   : > { %v826_v56 = vadd.f32 %v821_v21, %v517_v28 }
 0x4a6   : > { %v1736_v15 = vpop.xlane.xlu0 %1735 }
 0x4a7   : > { %v1121_v22 = vpop.xlane.xlu1 %1120  ;;  %v1737_v7 = vsel %vm3171_vm5, %v1736_v15, 0.0 }
 0x4a8   : > { %v1125_v41 = vsel %vm3157_vm3, %v1121_v22, 0.0  ;;  %v1739_v37 = vadd.f32 %v1737_v7, %v1435_v30 }
 0x4a9   : > { %v1130_v25 = vadd.f32 %v1125_v41, %v826_v56 }
 0x4aa   : > { %v1748_v62 = vrot.slane %v1739_v37, %v2793_v0 }
 0x4ab   : > { %v1425_v29 = vpop.xlane.xlu1 %1424 }
 0x4ac   : > { %v1429_v38 = vsel %vm3163_vm7, %v1425_v29, 0.0  ;;  %v1749_v63 = vsel %vm1744_vm8, %v1748_v62, 0.0 }
 0x4ad   : > { %v1434_v39 = vadd.f32 %v1429_v38, %v1130_v25 }
 0x4af   : > { %v1729_v1 = vpop.xlane.xlu1 %1728 }
 0x4b0   : > { %v1733_v61 = vsel %vm3171_vm5, %v1729_v1, 0.0 }
 0x4b1   : > { %v1738_v48 = vadd.f32 %v1733_v61, %v1434_v39 }
 0x4b3   : > { %v1743_v35 = vrot.slane %v1738_v48, %v2793_v0 }
 0x4b5   : > { %v1750_v9 = vsel %vm282_vm4, %v1743_v35, %v1749_v63 }
 0x4b6   : > { %1751 = vst [vmem:[%s207_s17] sm:$0xff] %v1750_v9 }
 0x4b7   : > { %2214 = shalt.err (!%p2211_p7)
}
 0x4b8   : > { %s2215_s15 = scalar_lea.hbm %s3197_s9, 128  ;;  %s2219_s20 = scalar_lea.hbm %s3246_s3, 256 }
 0x4b9   : > { %p2216_p9 = scmp.ne.s32.totalorder %s3197_s9, %s2215_s15  ;;  %p2220_p0 = scmp.lt.u32.totalorder %s3197_s9, %s3246_s3 }
 0x4ba   : > { %p2221_p13 = scmp.lt.u32.totalorder %s2219_s20, %s2215_s15  ;;  %p2223_p10 = scmp.lt.u32.totalorder %s2215_s15, %s3197_s9 }
 0x4bb   : > { %p2217_p2 = pnand %p2216_p9, %p3275_p12 }
 0x4bc   : > { %p2222_p8 = por %p2221_p13, %p2220_p0 }
 0x4bd   : > { %p2218_p4 = pneg %p2217_p2 }
 0x4be   : > { %p2224_p6 = por %p2223_p10, %p2222_p8 }
 0x4c0   : > { %p2225_p1 = pnand %p2224_p6, %p2218_p4 }
 0x4c2   : > { %2228 = shalt.err (!%p2225_p1)
}
 0x4c3   : > { %2025 = dma.vmem_to_hbm [thread:$0]  (%p3275_p12), %s3199_s21, 128, %s3197_s9, %s1753_s0  }
 0x4c4 PF: > { %s1778_s29 = sand.u32 1, %s2261_s22   ;;  %p3276_p11 = scmp.ne.s32.totalorder %s3251_s6, 0 }
 0x4c5   : > { %p3277_p3 = scmp.ge.s32.totalorder %s2273_s25, 2  ;;  %s1779_s8 = scalar_lea.sflag [#allocation6], %s1778_s29 }
 0x4c7   : > { %p2035_p5 = pnand %p3277_p3, %p3276_p11 }
 0x4c9   : > { %2256 = dma.done.wait (!%p2035_p5), %s1779_s8, 128  }
 0x4ca   : > { %2258 = vsyncadd (!%p2035_p5), %s1779_s8, 4294967168  ;;  %p23_p7 = scmp.ge.s32.totalorder %s2344_s27, 4   ;;  %s3278_s22 = smov %s2265_s23 }
 0x4cb   : > { %s3279_s23 = smov %s2269_s24  ;;  %s3280_s24 = smov %s2356_s30 }
 0x4cc   : > { %s3281_s25 = smov %s2344_s27  ;;  %25 = sbr.rel (!%p23_p7) target bundleno = 19 (0x13), region = 94 }
 0x4d3   :  { %1784 = vsyncpa [#allocation5], 1 }
 0x4d4   :  { %1786 = vsyncpa [#allocation5 + $0x1], 1 }
 0x4d5   :  { %1787 = vsyncpa [#allocation8], 1 }
 0x4d6   :  { %1789 = vsyncpa [#allocation8 + $0x1], 1 }
 0x4d7   :  { %1790 = vsyncpa [#allocation6], 1 }
 0x4d8   :  { %1792 = vsyncpa [#allocation6 + $0x1], 1 }

</bundles_post_ra>
